<compile_context>
chip_gen: v7x
topology: tpu7x:2x2x1
jax: 0.10.0
libtpu: 0.0.40
codegen_flags: <defaults>
</compile_context>

<pallas_src>
import functools

import jax
import jax.numpy as jnp
from jax import lax
from jax.experimental import pallas as pl
from jax.experimental.pallas import tpu as pltpu


def _round_up(a, b):
    return (a + b - 1) // b * b


def _physical_vmem_bytes():
    """Physical VMEM per TensorCore (v5e/v6e: 128 MiB, v7x: 64 MiB)."""
    try:
        info = pltpu.get_tpu_info()
        v = getattr(info, "vmem_capacity_bytes", None)
        if v:
            return int(v)
    except Exception:
        pass
    return 64 << 20  # conservative (v7x-sized) fallback


def _pb(rows, cols, itemsize=4):
    """Padded VMEM bytes of a (rows, cols) buffer under (8, 128) tiling."""
    return _round_up(rows, 8) * _round_up(cols, 128) * itemsize


# --------------------------------------------------------------------------- #
# K == 1 fast path: y = theta[:, :, 0] @ x + bias, tiled over columns.
# --------------------------------------------------------------------------- #
def _theta_only_kernel(x_ref, theta_ref, bias_ref, y_ref):
    y_ref[...] = (
        jnp.dot(theta_ref[...], x_ref[...], preferred_element_type=jnp.float32)
        + bias_ref[...]
    ).astype(y_ref.dtype)


# --------------------------------------------------------------------------- #
# Chebyshev kernel.  Grid = (K-1 recursion steps s, output-column tiles j,
# contraction tiles c).
#   L_ref:     (tile, tile)                  L[j_tile, c_tile] block (streamed/resident)
#   x_ref:     (C_in_pad, M_pad)             resident, zero-padded rows/cols
#   theta_ref: (K * C_out_pad, C_in_pad)     k-major, zero-padded (resident)
#   bias_ref:  (C_out_pad, 1)                resident
#   y_ref:     (C_out_pad, M_pad)            resident output, accumulated per step
#   X_ref:     (num_slots * C_in_pad, M_pad) 3-slot ring of Chebyshev terms
#   acc_ref:   (C_in_pad, tile)              partial sum for one (s, j)
# --------------------------------------------------------------------------- #
def _cheb_kernel(L_ref, x_ref, theta_ref, bias_ref, y_ref, X_ref, acc_ref,
                 *, C_in_pad, C_out_pad, tile):
    s = pl.program_id(0)          # this pass produces X_{s+1}
    j = pl.program_id(1)          # output-column tile of X_{s+1} (rows of L)
    c = pl.program_id(2)          # contraction tile (cols of L / cols of X_s)
    n_c = pl.num_programs(2)

    # ---- one-time init: X_0 = x into ring slot 0 (x already zero-padded) ----
    @pl.when((s == 0) & (j == 0) & (c == 0))
    def _():
        X_ref[pl.ds(0, C_in_pad), :] = x_ref[...]

    # ---- reset the per-(s, j) partial accumulator ----
    @pl.when(c == 0)
    def _():
        acc_ref[...] = jnp.zeros_like(acc_ref)

    # ---- acc += X_s[:, c_tile] @ L[j_tile, c_tile]^T (no L.T materialization) ----
    col_c = pl.multiple_of(c * tile, 128)
    cur_row = pl.multiple_of((s % 3) * C_in_pad, 8)
    xs_blk = X_ref[pl.ds(cur_row, C_in_pad), pl.ds(col_c, tile)]
    acc_ref[...] += lax.dot_general(
        xs_blk.astype(L_ref.dtype), L_ref[...],
        dimension_numbers=(((1,), (1,)), ((), ())),
        preferred_element_type=jnp.float32)

    # ---- on the last contraction tile: finalize X_{s+1}[:, j_tile], update y ----
    @pl.when(c == n_c - 1)
    def _():
        col_j = pl.multiple_of(j * tile, 128)
        prev_row = pl.multiple_of((jnp.maximum(s - 1, 0) % 3) * C_in_pad, 8)
        nxt_row = pl.multiple_of(((s + 1) % 3) * C_in_pad, 8)

        prev = X_ref[pl.ds(prev_row, C_in_pad), pl.ds(col_j, tile)]
        two = jnp.where(s > 0, 2.0, 1.0).astype(jnp.float32)
        sub = jnp.where(s > 0, 1.0, 0.0).astype(jnp.float32)
        x_new = two * acc_ref[...] - sub * prev                  # X_{s+1}[:, j_tile]
        X_ref[pl.ds(nxt_row, C_in_pad), pl.ds(col_j, tile)] = x_new

        th_row = pl.multiple_of((s + 1) * C_out_pad, 8)
        contrib = jnp.dot(theta_ref[pl.ds(th_row, C_out_pad), :], x_new,
                          preferred_element_type=jnp.float32)

        @pl.when(s == 0)
        def _():  # y = bias + theta_0 @ X_0 + theta_1 @ X_1
            th0 = theta_ref[pl.ds(0, C_out_pad), :]
            y_ref[:, pl.ds(col_j, tile)] = (
                bias_ref[...]
                + jnp.dot(th0, x_ref[:, pl.ds(col_j, tile)],
                          preferred_element_type=jnp.float32)
                + contrib).astype(y_ref.dtype)

        @pl.when(s > 0)
        def _():  # y += theta_{s+1} @ X_{s+1}
            y_ref[:, pl.ds(col_j, tile)] = (
                y_ref[:, pl.ds(col_j, tile)] + contrib).astype(y_ref.dtype)


# --------------------------------------------------------------------------- #
# Wrapper
# --------------------------------------------------------------------------- #
def simplicial_convolution(L, x, theta, bias=None, *, tile=None,
                           l_dtype=jnp.float32):
    """theta: (C_out, C_in, K); L: (M, M); x: (C_in, M). Returns y: (C_out, M).

    l_dtype=jnp.bfloat16 enables bf16 streaming of L (opt-in; recursion state,
    accumulators and y stay f32)."""
    C_out, C_in, K = theta.shape
    C_in_x, M = x.shape
    assert C_in_x == C_in
    assert L.shape == (M, M)

    C_in_pad = _round_up(C_in, 8)
    C_out_pad = _round_up(C_out, 8)

    xf = x.astype(jnp.float32)
    thf = theta.astype(jnp.float32)
    bf = (bias.astype(jnp.float32) if bias is not None
          else jnp.zeros((C_out, 1), jnp.float32))

    phys = _physical_vmem_bytes()
    budget = int(0.80 * phys)        # headroom for compiler-internal scratch

    # ---------------- K == 1: no Chebyshev recursion, no L needed ----------------
    if K == 1:
        tm = 1024 if M > 1024 else _round_up(M, 128)
        M_pad = _round_up(M, tm)
        xp = jnp.pad(xf, ((0, C_in_pad - C_in), (0, M_pad - M)))
        th0 = jnp.pad(thf[:, :, 0], ((0, C_out_pad - C_out), (0, C_in_pad - C_in)))
        bp = jnp.pad(bf, ((0, C_out_pad - C_out), (0, 0)))
        y = pl.pallas_call(
            _theta_only_kernel,
            out_shape=jax.ShapeDtypeStruct((C_out_pad, M_pad), jnp.float32),
            grid_spec=pltpu.PrefetchScalarGridSpec(
                num_scalar_prefetch=0,
                grid=(M_pad // tm,),
                in_specs=[pl.BlockSpec((C_in_pad, tm), lambda j: (0, j)),
                          pl.BlockSpec((C_out_pad, C_in_pad), lambda j: (0, 0)),
                          pl.BlockSpec((C_out_pad, 1), lambda j: (0, 0))],
                out_specs=pl.BlockSpec((C_out_pad, tm), lambda j: (0, j))),
            compiler_params=pltpu.CompilerParams(
                dimension_semantics=("parallel",)),
        )(xp, th0, bp)
        return y[:C_out, :M]

    # ---------------- tiling / resident-L decision (generation aware) ------------
    l_item = jnp.dtype(l_dtype).itemsize
    num_slots = 3 if K >= 3 else 2
    n_steps = K - 1

    def vmem_need(t, m_pad):
        # Conservative: assume the pipeline double-buffers every BlockSpec operand.
        # pl.Buffered(1) on constant-index inputs only reduces real usage below this.
        return (2 * _pb(t, t, l_item)                       # L
                + 2 * _pb(C_in_pad, m_pad)                  # x
                + 2 * _pb(K * C_out_pad, C_in_pad)          # theta
                + 2 * _pb(C_out_pad, 1)                     # bias
                + 2 * _pb(C_out_pad, m_pad)                 # y
                + num_slots * _pb(C_in_pad, m_pad)          # Chebyshev ring scratch
                + _pb(C_in_pad, t))                         # partial-sum scratch

    M_pad_full = _round_up(M, 128)
    if tile is None:
        if vmem_need(M_pad_full, M_pad_full) <= budget:
            tile = M_pad_full        # resident L: DMA'd once, reused by all K-1 passes
        else:
            tile = 256               # streamed L: big tiles amortize per-step overhead
            for cand in (1024, 512):
                if vmem_need(cand, _round_up(M, cand)) <= budget:
                    tile = cand
                    break
    else:
        assert tile % 128 == 0, "tile must be a multiple of 128"
    M_pad = _round_up(M, tile)
    n_tiles = M_pad // tile

    # ---------------- operand packing (all pads are zeros) -----------------------
    Lf = jnp.pad(L.astype(l_dtype), ((0, M_pad - M), (0, M_pad - M)))
    xp = jnp.pad(xf, ((0, C_in_pad - C_in), (0, M_pad - M)))
    th = jnp.transpose(thf, (2, 0, 1))                                # (K, C_out, C_in)
    th = jnp.pad(th, ((0, 0), (0, C_out_pad - C_out), (0, C_in_pad - C_in)))
    theta_2d = th.reshape(K * C_out_pad, C_in_pad)                    # k-major rows
    bias_p = jnp.pad(bf, ((0, C_out_pad - C_out), (0, 0)))

    kernel = functools.partial(_cheb_kernel, C_in_pad=C_in_pad,
                               C_out_pad=C_out_pad, tile=tile)

    need = vmem_need(tile, M_pad)
    vmem_limit = max(32 << 20, min(int(need * 1.2) + (4 << 20), int(0.92 * phys)))

    l_stream_passes = 1 if n_tiles == 1 else n_steps
    flops = (2 * n_steps * C_in_pad * M_pad * M_pad
             + 2 * K * C_out_pad * C_in_pad * M_pad)
    bytes_accessed = (l_item * l_stream_passes * M_pad * M_pad
                      + 4 * (C_in_pad * M_pad + C_out_pad * M_pad
                             + K * C_out_pad * C_in_pad + C_out_pad))

    grid = (n_steps, n_tiles, n_tiles)
    scratch_shapes = [
        pltpu.VMEM((num_slots * C_in_pad, M_pad), jnp.float32),  # Chebyshev ring
        pltpu.VMEM((C_in_pad, tile), jnp.float32),               # partial-sum acc
    ]

    def build(single_buffer_const):
        def const_spec(shape):
            if single_buffer_const:
                return pl.BlockSpec(shape, lambda s, j, c: (0, 0),
                                    pipeline_mode=pl.Buffered(1))
            return pl.BlockSpec(shape, lambda s, j, c: (0, 0))

        if n_tiles == 1 and single_buffer_const:   # resident L: index is constant too
            l_spec = pl.BlockSpec((tile, tile), lambda s, j, c: (j, c),
                                  pipeline_mode=pl.Buffered(1))
        else:
            l_spec = pl.BlockSpec((tile, tile), lambda s, j, c: (j, c))

        in_specs = [l_spec,
                    const_spec((C_in_pad, M_pad)),
                    const_spec((K * C_out_pad, C_in_pad)),
                    const_spec((C_out_pad, 1))]
        # Output keeps the default pipeline mode (writeback safety); its second
        # buffer is only C_out_pad * M_pad * 4 bytes.
        out_specs = pl.BlockSpec((C_out_pad, M_pad), lambda s, j, c: (0, 0))

        return pl.pallas_call(
            kernel,
            out_shape=jax.ShapeDtypeStruct((C_out_pad, M_pad), jnp.float32),
            grid_spec=pltpu.PrefetchScalarGridSpec(
                num_scalar_prefetch=0,
                grid=grid,
                in_specs=in_specs,
                out_specs=out_specs,
                scratch_shapes=scratch_shapes),
            compiler_params=pltpu.CompilerParams(
                dimension_semantics=("arbitrary", "arbitrary", "arbitrary"),
                vmem_limit_bytes=int(vmem_limit)),
            cost_estimate=pl.CostEstimate(
                flops=int(flops), transcendentals=0,
                bytes_accessed=int(bytes_accessed)),
        )

    try:
        y = build(True)(Lf, xp, theta_2d, bias_p)
    except Exception:
        # pl.Buffered(1) (single-buffered constant blocks) unsupported on this jax
        # version -> fall back to default double buffering (budgeted for above).
        y = build(False)(Lf, xp, theta_2d, bias_p)

    return y[:C_out, :M]


# --------------------------------------------------------------------------- #
# Pure-JAX reference matching the PyTorch module exactly.
# --------------------------------------------------------------------------- #
def _reference(L, x, theta, bias):
    C_out, C_in, K = theta.shape
    bars = [x]
    if K > 1:
        bars.append(x @ L.T)
        for k in range(2, K):
            bars.append(2.0 * (bars[k - 1] @ L.T) - bars[k - 2])
    X = jnp.stack(bars, axis=-1)                 # (C_in, M, K)
    return jnp.einsum("imk,oik->om", X, theta) + bias


if __name__ == "__main__":
    C_in, C_out, filter_size, num_simplices = 4, 8, 3, 256
    variance = 1.0

    key = jax.random.PRNGKey(0)
    k_l, k_x, k_theta = jax.random.split(key, 3)

    L = jax.random.normal(k_l, (num_simplices, num_simplices), dtype=jnp.float32) * 0.05
    L = 0.5 * (L + L.T)                                    # symmetric Laplacian-like
    x = jax.random.normal(k_x, (C_in, num_simplices), dtype=jnp.float32)
    theta = variance * jax.random.normal(
        k_theta, (C_out, C_in, filter_size), dtype=jnp.float32)
    bias = jnp.zeros((C_out, 1), dtype=jnp.float32)

    y_ref = _reference(L, x, theta, bias)

    # 1) default path: L resident in VMEM (single tile, one DMA for all K-1 passes)
    y = jax.block_until_ready(simplicial_convolution(L, x, theta, bias))
    assert y.shape == (C_out, num_simplices)
    assert jnp.allclose(y, y_ref, atol=1e-4, rtol=1e-4), "mismatch (resident-L path)"

    # 2) streamed / tiled path (same code path used when L does not fit in VMEM)
    y_t = jax.block_until_ready(simplicial_convolution(L, x, theta, bias, tile=128))
    assert jnp.allclose(y_t, y_ref, atol=1e-4, rtol=1e-4), "mismatch (tiled path)"

    # 3) non-multiple-of-128 num_simplices exercises the lane / sublane padding
    Ms = 200
    Ls, xs = L[:Ms, :Ms], x[:, :Ms]
    ys_ref = _reference(Ls, xs, theta, bias)
    ys = jax.block_until_ready(simplicial_convolution(Ls, xs, theta, bias))
    assert ys.shape == (C_out, Ms)
    assert jnp.allclose(ys, ys_ref, atol=1e-4, rtol=1e-4), "mismatch (padded-M path)"

    # 4) opt-in bf16 streaming of L (recursion / accumulation stay f32)
    y_bf = jax.block_until_ready(
        simplicial_convolution(L, x, theta, bias, tile=128, l_dtype=jnp.bfloat16))
    assert jnp.allclose(y_bf, y_ref, atol=2e-1, rtol=5e-2), "mismatch (bf16-L path)"

    # 5) filter_size == 1 fast path (tiled theta @ x + bias)
    theta1 = theta[:, :, :1]
    y1_ref = _reference(L, x, theta1, bias)
    y1 = jax.block_until_ready(simplicial_convolution(L, x, theta1, bias))
    assert jnp.allclose(y1, y1_ref, atol=1e-4, rtol=1e-4), "mismatch (K=1 path)"

    print("KERNEL_OK")
</pallas_src>

<mosaic_0001>
module attributes {stable_mosaic.version = 11 : i64} {
  func.func @_cheb_kernel(%arg0: i32, %arg1: i32, %arg2: i32, %arg3: memref<256x256xf32, #tpu.memory_space<vmem>>, %arg4: memref<8x256xf32, #tpu.memory_space<vmem>>, %arg5: memref<24x8xf32, #tpu.memory_space<vmem>>, %arg6: memref<8x1xf32, #tpu.memory_space<vmem>>, %arg7: memref<8x256xf32, #tpu.memory_space<vmem>>, %arg8: memref<24x256xf32, #tpu.memory_space<vmem>>, %arg9: memref<8x256xf32, #tpu.memory_space<vmem>>) attributes {dimension_semantics = [#tpu.dimension_semantics<arbitrary>, #tpu.dimension_semantics<arbitrary>, #tpu.dimension_semantics<arbitrary>], iteration_bounds = array<i64: 2, 1, 1>, scalar_prefetch = 0 : i64, scratch_operands = 2 : i64, tpu.core_type = #tpu.core_type<tc>, window_params = [{pipeline_mode = #tpu.pipeline_mode<synchronous>, transform_indices = @transform_0, window_bounds = array<i64: 256, 256>}, {pipeline_mode = #tpu.pipeline_mode<synchronous>, transform_indices = @transform_1, window_bounds = array<i64: 8, 256>}, {pipeline_mode = #tpu.pipeline_mode<synchronous>, transform_indices = @transform_2, window_bounds = array<i64: 24, 8>}, {pipeline_mode = #tpu.pipeline_mode<synchronous>, transform_indices = @transform_3, window_bounds = array<i64: 8, 1>}, {pipeline_mode = #tpu.pipeline_mode<synchronous>, transform_indices = @transform_4, window_bounds = array<i64: 8, 256>}]} {
    %c0_i32 = arith.constant 0 : i32
    %0 = arith.cmpi eq, %arg0, %c0_i32 : i32
    %c0_i32_0 = arith.constant 0 : i32
    %1 = arith.cmpi eq, %arg1, %c0_i32_0 : i32
    %2 = arith.andi %0, %1 : i1
    %c0_i32_1 = arith.constant 0 : i32
    %3 = arith.cmpi eq, %arg2, %c0_i32_1 : i32
    %4 = arith.andi %2, %3 : i1
    %5 = arith.extui %4 : i1 to i32
    %c0_i32_2 = arith.constant 0 : i32
    %6 = arith.cmpi ne, %5, %c0_i32_2 : i32
    scf.if %6 {
      %c0_16 = arith.constant 0 : index
      %c0_17 = arith.constant 0 : index
      %35 = vector.load %arg4[%c0_16, %c0_17] : memref<8x256xf32, #tpu.memory_space<vmem>>, vector<8x256xf32>
      %c0_18 = arith.constant 0 : index
      %c0_19 = arith.constant 0 : index
      %36 = vector.load %arg8[%c0_18, %c0_19] : memref<24x256xf32, #tpu.memory_space<vmem>>, vector<8x256xf32>
      tpu.vector_store %arg8[%c0_18, %c0_19], %35 {strides = array<i32>} : memref<24x256xf32, #tpu.memory_space<vmem>>, vector<8x256xf32>,
    } else {
    }
    %c0_i32_3 = arith.constant 0 : i32
    %7 = arith.cmpi eq, %arg2, %c0_i32_3 : i32
    %8 = arith.extui %7 : i1 to i32
    %c0_i32_4 = arith.constant 0 : i32
    %9 = arith.cmpi ne, %8, %c0_i32_4 : i32
    scf.if %9 {
      %cst_16 = arith.constant 0.000000e+00 : f32
      %35 = vector.broadcast %cst_16 : f32 to vector<8x256xf32>
      %c0_17 = arith.constant 0 : index
      %c0_18 = arith.constant 0 : index
      %36 = vector.load %arg9[%c0_17, %c0_18] : memref<8x256xf32, #tpu.memory_space<vmem>>, vector<8x256xf32>
      tpu.vector_store %arg9[%c0_17, %c0_18], %35 {strides = array<i32>} : memref<8x256xf32, #tpu.memory_space<vmem>>, vector<8x256xf32>,
    } else {
    }
    %c256_i32 = arith.constant 256 : i32
    %10 = arith.muli %arg2, %c256_i32 : i32
    %11 = tpu.assume_multiple %10, 128 : i32
    %c3_i32 = arith.constant 3 : i32
    %c0_i32_5 = arith.constant 0 : i32
    %12 = arith.cmpi eq, %c3_i32, %c0_i32_5 : i32
    %c1_i32 = arith.constant 1 : i32
    %13 = arith.select %12, %c1_i32, %c3_i32 : i32
    %14 = arith.remsi %arg0, %13 : i32
    %c0_i32_6 = arith.constant 0 : i32
    %15 = arith.cmpi ne, %14, %c0_i32_6 : i32
    %c0_i32_7 = arith.constant 0 : i32
    %16 = arith.cmpi slt, %14, %c0_i32_7 : i32
    %c0_i32_8 = arith.constant 0 : i32
    %17 = arith.cmpi slt, %13, %c0_i32_8 : i32
    %18 = arith.xori %16, %17 : i1
    %19 = arith.andi %18, %15 : i1
    %20 = arith.addi %14, %13 : i32
    %21 = arith.select %19, %20, %14 : i32
    %c8_i32 = arith.constant 8 : i32
    %22 = arith.muli %21, %c8_i32 : i32
    %23 = tpu.assume_multiple %22, 8 : i32
    %24 = arith.index_cast %23 : i32 to index
    %25 = arith.index_cast %11 : i32 to index
    %26 = vector.load %arg8[%24, %25] : memref<24x256xf32, #tpu.memory_space<vmem>>, vector<8x256xf32>
    %c0 = arith.constant 0 : index
    %c0_9 = arith.constant 0 : index
    %27 = vector.load %arg9[%c0, %c0_9] : memref<8x256xf32, #tpu.memory_space<vmem>>, vector<8x256xf32>
    %c0_10 = arith.constant 0 : index
    %c0_11 = arith.constant 0 : index
    %28 = vector.load %arg3[%c0_10, %c0_11] : memref<256x256xf32, #tpu.memory_space<vmem>>, vector<256x256xf32>
    %cst = arith.constant dense<0.000000e+00> : vector<8x256xf32>
    %29 = tpu.matmul %26, %28, %cst {dimension_numbers = #tpu.dot_dimension_numbers<[1], [1], [0], [0], [0, 0, 1, 0], [], []>} : vector<8x256xf32>, vector<256x256xf32>, vector<8x256xf32> -> vector<8x256xf32>
    %30 = arith.addf %27, %29 : vector<8x256xf32>
    %c0_12 = arith.constant 0 : index
    %c0_13 = arith.constant 0 : index
    %31 = vector.load %arg9[%c0_12, %c0_13] : memref<8x256xf32, #tpu.memory_space<vmem>>, vector<8x256xf32>
    tpu.vector_store %arg9[%c0_12, %c0_13], %30 {strides = array<i32>} : memref<8x256xf32, #tpu.memory_space<vmem>>, vector<8x256xf32>,
    %c0_i32_14 = arith.constant 0 : i32
    %32 = arith.cmpi eq, %arg2, %c0_i32_14 : i32
    %33 = arith.extui %32 : i1 to i32
    %c0_i32_15 = arith.constant 0 : i32
    %34 = arith.cmpi ne, %33, %c0_i32_15 : i32
    scf.if %34 {
      %c256_i32_16 = arith.constant 256 : i32
      %35 = arith.muli %arg1, %c256_i32_16 : i32
      %36 = tpu.assume_multiple %35, 128 : i32
      %c1_i32_17 = arith.constant 1 : i32
      %37 = arith.subi %arg0, %c1_i32_17 : i32
      %c0_i32_18 = arith.constant 0 : i32
      %38 = arith.maxsi %37, %c0_i32_18 : i32
      %c3_i32_19 = arith.constant 3 : i32
      %c0_i32_20 = arith.constant 0 : i32
      %39 = arith.cmpi eq, %c3_i32_19, %c0_i32_20 : i32
      %c1_i32_21 = arith.constant 1 : i32
      %40 = arith.select %39, %c1_i32_21, %c3_i32_19 : i32
      %41 = arith.remsi %38, %40 : i32
      %c0_i32_22 = arith.constant 0 : i32
      %42 = arith.cmpi ne, %41, %c0_i32_22 : i32
      %c0_i32_23 = arith.constant 0 : i32
      %43 = arith.cmpi slt, %41, %c0_i32_23 : i32
      %c0_i32_24 = arith.constant 0 : i32
      %44 = arith.cmpi slt, %40, %c0_i32_24 : i32
      %45 = arith.xori %43, %44 : i1
      %46 = arith.andi %45, %42 : i1
      %47 = arith.addi %41, %40 : i32
      %48 = arith.select %46, %47, %41 : i32
      %c8_i32_25 = arith.constant 8 : i32
      %49 = arith.muli %48, %c8_i32_25 : i32
      %50 = tpu.assume_multiple %49, 8 : i32
      %c1_i32_26 = arith.constant 1 : i32
      %51 = arith.addi %arg0, %c1_i32_26 : i32
      %c3_i32_27 = arith.constant 3 : i32
      %c0_i32_28 = arith.constant 0 : i32
      %52 = arith.cmpi eq, %c3_i32_27, %c0_i32_28 : i32
      %c1_i32_29 = arith.constant 1 : i32
      %53 = arith.select %52, %c1_i32_29, %c3_i32_27 : i32
      %54 = arith.remsi %51, %53 : i32
      %c0_i32_30 = arith.constant 0 : i32
      %55 = arith.cmpi ne, %54, %c0_i32_30 : i32
      %c0_i32_31 = arith.constant 0 : i32
      %56 = arith.cmpi slt, %54, %c0_i32_31 : i32
      %c0_i32_32 = arith.constant 0 : i32
      %57 = arith.cmpi slt, %53, %c0_i32_32 : i32
      %58 = arith.xori %56, %57 : i1
      %59 = arith.andi %58, %55 : i1
      %60 = arith.addi %54, %53 : i32
      %61 = arith.select %59, %60, %54 : i32
      %c8_i32_33 = arith.constant 8 : i32
      %62 = arith.muli %61, %c8_i32_33 : i32
      %63 = tpu.assume_multiple %62, 8 : i32
      %64 = arith.index_cast %50 : i32 to index
      %65 = arith.index_cast %36 : i32 to index
      %66 = vector.load %arg8[%64, %65] : memref<24x256xf32, #tpu.memory_space<vmem>>, vector<8x256xf32>
      %c0_i32_34 = arith.constant 0 : i32
      %67 = arith.cmpi sgt, %arg0, %c0_i32_34 : i32
      %cst_35 = arith.constant 2.000000e+00 : f32
      %cst_36 = arith.constant 1.000000e+00 : f32
      %68 = arith.select %67, %cst_35, %cst_36 : f32
      %c0_i32_37 = arith.constant 0 : i32
      %69 = arith.cmpi sgt, %arg0, %c0_i32_37 : i32
      %cst_38 = arith.constant 1.000000e+00 : f32
      %cst_39 = arith.constant 0.000000e+00 : f32
      %70 = arith.select %69, %cst_38, %cst_39 : f32
      %c0_40 = arith.constant 0 : index
      %c0_41 = arith.constant 0 : index
      %71 = vector.load %arg9[%c0_40, %c0_41] : memref<8x256xf32, #tpu.memory_space<vmem>>, vector<8x256xf32>
      %72 = vector.broadcast %68 : f32 to vector<8x256xf32>
      %73 = arith.mulf %72, %71 : vector<8x256xf32>
      %74 = vector.broadcast %70 : f32 to vector<8x256xf32>
      %75 = arith.mulf %74, %66 : vector<8x256xf32>
      %76 = arith.subf %73, %75 : vector<8x256xf32>
      %77 = arith.index_cast %63 : i32 to index
      %78 = arith.index_cast %36 : i32 to index
      %79 = vector.load %arg8[%77, %78] : memref<24x256xf32, #tpu.memory_space<vmem>>, vector<8x256xf32>
      tpu.vector_store %arg8[%77, %78], %76 {strides = array<i32>} : memref<24x256xf32, #tpu.memory_space<vmem>>, vector<8x256xf32>,
      %c1_i32_42 = arith.constant 1 : i32
      %80 = arith.addi %arg0, %c1_i32_42 : i32
      %c8_i32_43 = arith.constant 8 : i32
      %81 = arith.muli %80, %c8_i32_43 : i32
      %82 = tpu.assume_multiple %81, 8 : i32
      %83 = arith.index_cast %82 : i32 to index
      %c0_44 = arith.constant 0 : index
      %84 = vector.load %arg5[%83, %c0_44] : memref<24x8xf32, #tpu.memory_space<vmem>>, vector<8x8xf32>
      %cst_45 = arith.constant dense<0.000000e+00> : vector<8x256xf32>
      %85 = tpu.matmul %84, %76, %cst_45 {dimension_numbers = #tpu.dot_dimension_numbers<[1], [0], [0], [1], [0, 0, 1, 1], [], []>} : vector<8x8xf32>, vector<8x256xf32>, vector<8x256xf32> -> vector<8x256xf32>
      %c0_i32_46 = arith.constant 0 : i32
      %86 = arith.cmpi eq, %arg0, %c0_i32_46 : i32
      %87 = arith.extui %86 : i1 to i32
      %c0_i32_47 = arith.constant 0 : i32
      %88 = arith.cmpi ne, %87, %c0_i32_47 : i32
      scf.if %88 {
        %c0_50 = arith.constant 0 : index
        %c0_51 = arith.constant 0 : index
        %92 = vector.load %arg5[%c0_50, %c0_51] : memref<24x8xf32, #tpu.memory_space<vmem>>, vector<8x8xf32>
        %c0_52 = arith.constant 0 : index
        %c0_53 = arith.constant 0 : index
        %93 = vector.load %arg6[%c0_52, %c0_53] : memref<8x1xf32, #tpu.memory_space<vmem>>, vector<8x1xf32>
        %c0_54 = arith.constant 0 : index
        %94 = arith.index_cast %36 : i32 to index
        %95 = vector.load %arg4[%c0_54, %94] : memref<8x256xf32, #tpu.memory_space<vmem>>, vector<8x256xf32>
        %cst_55 = arith.constant dense<0.000000e+00> : vector<8x256xf32>
        %96 = tpu.matmul %92, %95, %cst_55 {dimension_numbers = #tpu.dot_dimension_numbers<[1], [0], [0], [1], [0, 0, 1, 1], [], []>} : vector<8x8xf32>, vector<8x256xf32>, vector<8x256xf32> -> vector<8x256xf32>
        %97 = vector.broadcast %93 : vector<8x1xf32> to vector<8x256xf32>
        %98 = arith.addf %97, %96 : vector<8x256xf32>
        %99 = arith.addf %98, %85 : vector<8x256xf32>
        %c0_56 = arith.constant 0 : index
        %100 = arith.index_cast %36 : i32 to index
        %101 = vector.load %arg7[%c0_56, %100] : memref<8x256xf32, #tpu.memory_space<vmem>>, vector<8x256xf32>
        tpu.vector_store %arg7[%c0_56, %100], %99 {strides = array<i32>} : memref<8x256xf32, #tpu.memory_space<vmem>>, vector<8x256xf32>,
      } else {
      }
      %c0_i32_48 = arith.constant 0 : i32
      %89 = arith.cmpi sgt, %arg0, %c0_i32_48 : i32
      %90 = arith.extui %89 : i1 to i32
      %c0_i32_49 = arith.constant 0 : i32
      %91 = arith.cmpi ne, %90, %c0_i32_49 : i32
      scf.if %91 {
        %c0_50 = arith.constant 0 : index
        %92 = arith.index_cast %36 : i32 to index
        %93 = vector.load %arg7[%c0_50, %92] : memref<8x256xf32, #tpu.memory_space<vmem>>, vector<8x256xf32>
        %94 = arith.addf %93, %85 : vector<8x256xf32>
        %c0_51 = arith.constant 0 : index
        %95 = arith.index_cast %36 : i32 to index
        %96 = vector.load %arg7[%c0_51, %95] : memref<8x256xf32, #tpu.memory_space<vmem>>, vector<8x256xf32>
        tpu.vector_store %arg7[%c0_51, %95], %94 {strides = array<i32>} : memref<8x256xf32, #tpu.memory_space<vmem>>, vector<8x256xf32>,
      } else {
      }
    } else {
    }
    return
  }
  func.func @transform_0(%arg0: i32, %arg1: i32, %arg2: i32) -> (i32, i32) {
    %c0_i32 = arith.constant 0 : i32
    return %arg1, %arg2 : i32, i32
  }
  func.func @transform_1(%arg0: i32, %arg1: i32, %arg2: i32) -> (i32, i32) {
    %c0_i32 = arith.constant 0 : i32
    %c0_i32_0 = arith.constant 0 : i32
    %c0_i32_1 = arith.constant 0 : i32
    return %c0_i32, %c0_i32_0 : i32, i32
  }
  func.func @transform_2(%arg0: i32, %arg1: i32, %arg2: i32) -> (i32, i32) {
    %c0_i32 = arith.constant 0 : i32
    %c0_i32_0 = arith.constant 0 : i32
    %c0_i32_1 = arith.constant 0 : i32
    return %c0_i32, %c0_i32_0 : i32, i32
  }
  func.func @transform_3(%arg0: i32, %arg1: i32, %arg2: i32) -> (i32, i32) {
    %c0_i32 = arith.constant 0 : i32
    %c0_i32_0 = arith.constant 0 : i32
    %c0_i32_1 = arith.constant 0 : i32
    return %c0_i32, %c0_i32_0 : i32, i32
  }
  func.func @transform_4(%arg0: i32, %arg1: i32, %arg2: i32) -> (i32, i32) {
    %c0_i32 = arith.constant 0 : i32
    %c0_i32_0 = arith.constant 0 : i32
    %c0_i32_1 = arith.constant 0 : i32
    return %c0_i32, %c0_i32_0 : i32, i32
  }
}

module attributes {stable_mosaic.version = 11 : i64} {
  func.func @_cheb_kernel(%arg0: i32, %arg1: i32, %arg2: i32, %arg3: memref<256x256xf32, #tpu.memory_space<vmem>>, %arg4: memref<8x256xf32, #tpu.memory_space<vmem>>, %arg5: memref<24x8xf32, #tpu.memory_space<vmem>>, %arg6: memref<8x1xf32, #tpu.memory_space<vmem>>, %arg7: memref<8x256xf32, #tpu.memory_space<vmem>>, %arg8: memref<24x256xf32, #tpu.memory_space<vmem>>, %arg9: memref<8x256xf32, #tpu.memory_space<vmem>>) attributes {dimension_semantics = [#tpu.dimension_semantics<arbitrary>, #tpu.dimension_semantics<arbitrary>, #tpu.dimension_semantics<arbitrary>], iteration_bounds = array<i64: 2, 1, 1>, scalar_prefetch = 0 : i64, scratch_operands = 2 : i64, tpu.core_type = #tpu.core_type<tc>, window_params = [{transform_indices = @transform_0, window_bounds = array<i64: 256, 256>}, {pipeline_mode = #tpu.pipeline_mode<synchronous>, transform_indices = @transform_1, window_bounds = array<i64: 8, 256>}, {pipeline_mode = #tpu.pipeline_mode<synchronous>, transform_indices = @transform_2, window_bounds = array<i64: 24, 8>}, {pipeline_mode = #tpu.pipeline_mode<synchronous>, transform_indices = @transform_3, window_bounds = array<i64: 8, 1>}, {pipeline_mode = #tpu.pipeline_mode<synchronous>, transform_indices = @transform_4, window_bounds = array<i64: 8, 256>}]} {
    %c0_i32 = arith.constant 0 : i32
    %0 = arith.cmpi eq, %arg0, %c0_i32 : i32
    %c0_i32_0 = arith.constant 0 : i32
    %1 = arith.cmpi eq, %arg1, %c0_i32_0 : i32
    %2 = arith.andi %0, %1 : i1
    %c0_i32_1 = arith.constant 0 : i32
    %3 = arith.cmpi eq, %arg2, %c0_i32_1 : i32
    %4 = arith.andi %2, %3 : i1
    %5 = arith.extui %4 : i1 to i32
    %c0_i32_2 = arith.constant 0 : i32
    %6 = arith.cmpi ne, %5, %c0_i32_2 : i32
    scf.if %6 {
      %c0_16 = arith.constant 0 : index
      %c0_17 = arith.constant 0 : index
      %35 = vector.load %arg4[%c0_16, %c0_17] : memref<8x256xf32, #tpu.memory_space<vmem>>, vector<8x256xf32>
      %c0_18 = arith.constant 0 : index
      %c0_19 = arith.constant 0 : index
      %36 = vector.load %arg8[%c0_18, %c0_19] : memref<24x256xf32, #tpu.memory_space<vmem>>, vector<8x256xf32>
      tpu.vector_store %arg8[%c0_18, %c0_19], %35 {strides = array<i32>} : memref<24x256xf32, #tpu.memory_space<vmem>>, vector<8x256xf32>,
    } else {
    }
    %c0_i32_3 = arith.constant 0 : i32
    %7 = arith.cmpi eq, %arg2, %c0_i32_3 : i32
    %8 = arith.extui %7 : i1 to i32
    %c0_i32_4 = arith.constant 0 : i32
    %9 = arith.cmpi ne, %8, %c0_i32_4 : i32
    scf.if %9 {
      %cst_16 = arith.constant 0.000000e+00 : f32
      %35 = vector.broadcast %cst_16 : f32 to vector<8x256xf32>
      %c0_17 = arith.constant 0 : index
      %c0_18 = arith.constant 0 : index
      %36 = vector.load %arg9[%c0_17, %c0_18] : memref<8x256xf32, #tpu.memory_space<vmem>>, vector<8x256xf32>
      tpu.vector_store %arg9[%c0_17, %c0_18], %35 {strides = array<i32>} : memref<8x256xf32, #tpu.memory_space<vmem>>, vector<8x256xf32>,
    } else {
    }
    %c256_i32 = arith.constant 256 : i32
    %10 = arith.muli %arg2, %c256_i32 : i32
    %11 = tpu.assume_multiple %10, 128 : i32
    %c3_i32 = arith.constant 3 : i32
    %c0_i32_5 = arith.constant 0 : i32
    %12 = arith.cmpi eq, %c3_i32, %c0_i32_5 : i32
    %c1_i32 = arith.constant 1 : i32
    %13 = arith.select %12, %c1_i32, %c3_i32 : i32
    %14 = arith.remsi %arg0, %13 : i32
    %c0_i32_6 = arith.constant 0 : i32
    %15 = arith.cmpi ne, %14, %c0_i32_6 : i32
    %c0_i32_7 = arith.constant 0 : i32
    %16 = arith.cmpi slt, %14, %c0_i32_7 : i32
    %c0_i32_8 = arith.constant 0 : i32
    %17 = arith.cmpi slt, %13, %c0_i32_8 : i32
    %18 = arith.xori %16, %17 : i1
    %19 = arith.andi %18, %15 : i1
    %20 = arith.addi %14, %13 : i32
    %21 = arith.select %19, %20, %14 : i32
    %c8_i32 = arith.constant 8 : i32
    %22 = arith.muli %21, %c8_i32 : i32
    %23 = tpu.assume_multiple %22, 8 : i32
    %24 = arith.index_cast %23 : i32 to index
    %25 = arith.index_cast %11 : i32 to index
    %26 = vector.load %arg8[%24, %25] : memref<24x256xf32, #tpu.memory_space<vmem>>, vector<8x256xf32>
    %c0 = arith.constant 0 : index
    %c0_9 = arith.constant 0 : index
    %27 = vector.load %arg9[%c0, %c0_9] : memref<8x256xf32, #tpu.memory_space<vmem>>, vector<8x256xf32>
    %c0_10 = arith.constant 0 : index
    %c0_11 = arith.constant 0 : index
    %28 = vector.load %arg3[%c0_10, %c0_11] : memref<256x256xf32, #tpu.memory_space<vmem>>, vector<256x256xf32>
    %cst = arith.constant dense<0.000000e+00> : vector<8x256xf32>
    %29 = tpu.matmul %26, %28, %cst {dimension_numbers = #tpu.dot_dimension_numbers<[1], [1], [0], [0], [0, 0, 1, 0], [], []>} : vector<8x256xf32>, vector<256x256xf32>, vector<8x256xf32> -> vector<8x256xf32>
    %30 = arith.addf %27, %29 : vector<8x256xf32>
    %c0_12 = arith.constant 0 : index
    %c0_13 = arith.constant 0 : index
    %31 = vector.load %arg9[%c0_12, %c0_13] : memref<8x256xf32, #tpu.memory_space<vmem>>, vector<8x256xf32>
    tpu.vector_store %arg9[%c0_12, %c0_13], %30 {strides = array<i32>} : memref<8x256xf32, #tpu.memory_space<vmem>>, vector<8x256xf32>,
    %c0_i32_14 = arith.constant 0 : i32
    %32 = arith.cmpi eq, %arg2, %c0_i32_14 : i32
    %33 = arith.extui %32 : i1 to i32
    %c0_i32_15 = arith.constant 0 : i32
    %34 = arith.cmpi ne, %33, %c0_i32_15 : i32
    scf.if %34 {
      %c256_i32_16 = arith.constant 256 : i32
      %35 = arith.muli %arg1, %c256_i32_16 : i32
      %36 = tpu.assume_multiple %35, 128 : i32
      %c1_i32_17 = arith.constant 1 : i32
      %37 = arith.subi %arg0, %c1_i32_17 : i32
      %c0_i32_18 = arith.constant 0 : i32
      %38 = arith.maxsi %37, %c0_i32_18 : i32
      %c3_i32_19 = arith.constant 3 : i32
      %c0_i32_20 = arith.constant 0 : i32
      %39 = arith.cmpi eq, %c3_i32_19, %c0_i32_20 : i32
      %c1_i32_21 = arith.constant 1 : i32
      %40 = arith.select %39, %c1_i32_21, %c3_i32_19 : i32
      %41 = arith.remsi %38, %40 : i32
      %c0_i32_22 = arith.constant 0 : i32
      %42 = arith.cmpi ne, %41, %c0_i32_22 : i32
      %c0_i32_23 = arith.constant 0 : i32
      %43 = arith.cmpi slt, %41, %c0_i32_23 : i32
      %c0_i32_24 = arith.constant 0 : i32
      %44 = arith.cmpi slt, %40, %c0_i32_24 : i32
      %45 = arith.xori %43, %44 : i1
      %46 = arith.andi %45, %42 : i1
      %47 = arith.addi %41, %40 : i32
      %48 = arith.select %46, %47, %41 : i32
      %c8_i32_25 = arith.constant 8 : i32
      %49 = arith.muli %48, %c8_i32_25 : i32
      %50 = tpu.assume_multiple %49, 8 : i32
      %c1_i32_26 = arith.constant 1 : i32
      %51 = arith.addi %arg0, %c1_i32_26 : i32
      %c3_i32_27 = arith.constant 3 : i32
      %c0_i32_28 = arith.constant 0 : i32
      %52 = arith.cmpi eq, %c3_i32_27, %c0_i32_28 : i32
      %c1_i32_29 = arith.constant 1 : i32
      %53 = arith.select %52, %c1_i32_29, %c3_i32_27 : i32
      %54 = arith.remsi %51, %53 : i32
      %c0_i32_30 = arith.constant 0 : i32
      %55 = arith.cmpi ne, %54, %c0_i32_30 : i32
      %c0_i32_31 = arith.constant 0 : i32
      %56 = arith.cmpi slt, %54, %c0_i32_31 : i32
      %c0_i32_32 = arith.constant 0 : i32
      %57 = arith.cmpi slt, %53, %c0_i32_32 : i32
      %58 = arith.xori %56, %57 : i1
      %59 = arith.andi %58, %55 : i1
      %60 = arith.addi %54, %53 : i32
      %61 = arith.select %59, %60, %54 : i32
      %c8_i32_33 = arith.constant 8 : i32
      %62 = arith.muli %61, %c8_i32_33 : i32
      %63 = tpu.assume_multiple %62, 8 : i32
      %64 = arith.index_cast %50 : i32 to index
      %65 = arith.index_cast %36 : i32 to index
      %66 = vector.load %arg8[%64, %65] : memref<24x256xf32, #tpu.memory_space<vmem>>, vector<8x256xf32>
      %c0_i32_34 = arith.constant 0 : i32
      %67 = arith.cmpi sgt, %arg0, %c0_i32_34 : i32
      %cst_35 = arith.constant 2.000000e+00 : f32
      %cst_36 = arith.constant 1.000000e+00 : f32
      %68 = arith.select %67, %cst_35, %cst_36 : f32
      %c0_i32_37 = arith.constant 0 : i32
      %69 = arith.cmpi sgt, %arg0, %c0_i32_37 : i32
      %cst_38 = arith.constant 1.000000e+00 : f32
      %cst_39 = arith.constant 0.000000e+00 : f32
      %70 = arith.select %69, %cst_38, %cst_39 : f32
      %c0_40 = arith.constant 0 : index
      %c0_41 = arith.constant 0 : index
      %71 = vector.load %arg9[%c0_40, %c0_41] : memref<8x256xf32, #tpu.memory_space<vmem>>, vector<8x256xf32>
      %72 = vector.broadcast %68 : f32 to vector<8x256xf32>
      %73 = arith.mulf %72, %71 : vector<8x256xf32>
      %74 = vector.broadcast %70 : f32 to vector<8x256xf32>
      %75 = arith.mulf %74, %66 : vector<8x256xf32>
      %76 = arith.subf %73, %75 : vector<8x256xf32>
      %77 = arith.index_cast %63 : i32 to index
      %78 = arith.index_cast %36 : i32 to index
      %79 = vector.load %arg8[%77, %78] : memref<24x256xf32, #tpu.memory_space<vmem>>, vector<8x256xf32>
      tpu.vector_store %arg8[%77, %78], %76 {strides = array<i32>} : memref<24x256xf32, #tpu.memory_space<vmem>>, vector<8x256xf32>,
      %c1_i32_42 = arith.constant 1 : i32
      %80 = arith.addi %arg0, %c1_i32_42 : i32
      %c8_i32_43 = arith.constant 8 : i32
      %81 = arith.muli %80, %c8_i32_43 : i32
      %82 = tpu.assume_multiple %81, 8 : i32
      %83 = arith.index_cast %82 : i32 to index
      %c0_44 = arith.constant 0 : index
      %84 = vector.load %arg5[%83, %c0_44] : memref<24x8xf32, #tpu.memory_space<vmem>>, vector<8x8xf32>
      %cst_45 = arith.constant dense<0.000000e+00> : vector<8x256xf32>
      %85 = tpu.matmul %84, %76, %cst_45 {dimension_numbers = #tpu.dot_dimension_numbers<[1], [0], [0], [1], [0, 0, 1, 1], [], []>} : vector<8x8xf32>, vector<8x256xf32>, vector<8x256xf32> -> vector<8x256xf32>
      %c0_i32_46 = arith.constant 0 : i32
      %86 = arith.cmpi eq, %arg0, %c0_i32_46 : i32
      %87 = arith.extui %86 : i1 to i32
      %c0_i32_47 = arith.constant 0 : i32
      %88 = arith.cmpi ne, %87, %c0_i32_47 : i32
      scf.if %88 {
        %c0_50 = arith.constant 0 : index
        %c0_51 = arith.constant 0 : index
        %92 = vector.load %arg5[%c0_50, %c0_51] : memref<24x8xf32, #tpu.memory_space<vmem>>, vector<8x8xf32>
        %c0_52 = arith.constant 0 : index
        %c0_53 = arith.constant 0 : index
        %93 = vector.load %arg6[%c0_52, %c0_53] : memref<8x1xf32, #tpu.memory_space<vmem>>, vector<8x1xf32>
        %c0_54 = arith.constant 0 : index
        %94 = arith.index_cast %36 : i32 to index
        %95 = vector.load %arg4[%c0_54, %94] : memref<8x256xf32, #tpu.memory_space<vmem>>, vector<8x256xf32>
        %cst_55 = arith.constant dense<0.000000e+00> : vector<8x256xf32>
        %96 = tpu.matmul %92, %95, %cst_55 {dimension_numbers = #tpu.dot_dimension_numbers<[1], [0], [0], [1], [0, 0, 1, 1], [], []>} : vector<8x8xf32>, vector<8x256xf32>, vector<8x256xf32> -> vector<8x256xf32>
        %97 = vector.broadcast %93 : vector<8x1xf32> to vector<8x256xf32>
        %98 = arith.addf %97, %96 : vector<8x256xf32>
        %99 = arith.addf %98, %85 : vector<8x256xf32>
        %c0_56 = arith.constant 0 : index
        %100 = arith.index_cast %36 : i32 to index
        %101 = vector.load %arg7[%c0_56, %100] : memref<8x256xf32, #tpu.memory_space<vmem>>, vector<8x256xf32>
        tpu.vector_store %arg7[%c0_56, %100], %99 {strides = array<i32>} : memref<8x256xf32, #tpu.memory_space<vmem>>, vector<8x256xf32>,
      } else {
      }
      %c0_i32_48 = arith.constant 0 : i32
      %89 = arith.cmpi sgt, %arg0, %c0_i32_48 : i32
      %90 = arith.extui %89 : i1 to i32
      %c0_i32_49 = arith.constant 0 : i32
      %91 = arith.cmpi ne, %90, %c0_i32_49 : i32
      scf.if %91 {
        %c0_50 = arith.constant 0 : index
        %92 = arith.index_cast %36 : i32 to index
        %93 = vector.load %arg7[%c0_50, %92] : memref<8x256xf32, #tpu.memory_space<vmem>>, vector<8x256xf32>
        %94 = arith.addf %93, %85 : vector<8x256xf32>
        %c0_51 = arith.constant 0 : index
        %95 = arith.index_cast %36 : i32 to index
        %96 = vector.load %arg7[%c0_51, %95] : memref<8x256xf32, #tpu.memory_space<vmem>>, vector<8x256xf32>
        tpu.vector_store %arg7[%c0_51, %95], %94 {strides = array<i32>} : memref<8x256xf32, #tpu.memory_space<vmem>>, vector<8x256xf32>,
      } else {
      }
    } else {
    }
    return
  }
  func.func @transform_0(%arg0: i32, %arg1: i32, %arg2: i32) -> (i32, i32) {
    %c0_i32 = arith.constant 0 : i32
    return %arg1, %arg2 : i32, i32
  }
  func.func @transform_1(%arg0: i32, %arg1: i32, %arg2: i32) -> (i32, i32) {
    %c0_i32 = arith.constant 0 : i32
    %c0_i32_0 = arith.constant 0 : i32
    %c0_i32_1 = arith.constant 0 : i32
    return %c0_i32, %c0_i32_0 : i32, i32
  }
  func.func @transform_2(%arg0: i32, %arg1: i32, %arg2: i32) -> (i32, i32) {
    %c0_i32 = arith.constant 0 : i32
    %c0_i32_0 = arith.constant 0 : i32
    %c0_i32_1 = arith.constant 0 : i32
    return %c0_i32, %c0_i32_0 : i32, i32
  }
  func.func @transform_3(%arg0: i32, %arg1: i32, %arg2: i32) -> (i32, i32) {
    %c0_i32 = arith.constant 0 : i32
    %c0_i32_0 = arith.constant 0 : i32
    %c0_i32_1 = arith.constant 0 : i32
    return %c0_i32, %c0_i32_0 : i32, i32
  }
  func.func @transform_4(%arg0: i32, %arg1: i32, %arg2: i32) -> (i32, i32) {
    %c0_i32 = arith.constant 0 : i32
    %c0_i32_0 = arith.constant 0 : i32
    %c0_i32_1 = arith.constant 0 : i32
    return %c0_i32, %c0_i32_0 : i32, i32
  }
}

</mosaic_0001>

<bundles_post_ra>
// kernel: tpu_custom_call.1
= control target key start
LH: loop header
LB: loop body
LE: loop exit
PB: predicated region body
PF: predicated region fallthrough
CT: control target
= control target key end

     0   :  { %9 = vsyncpa [#allocation5], 0  ;;  %s1156_s0 = inlined_call_operand.hbm [shape: f32[256,256], index: 0, kind: input, shape index: {}]   ;;  %s1157_s1 = inlined_call_operand.vmem [shape: f32[8,256], index: 1, kind: input, shape index: {}]   ;;  %s1158_s2 = inlined_call_operand.vmem [shape: f32[24,8], index: 2, kind: input, shape index: {}]   ;;  %s1159_s3 = inlined_call_operand.vmem [shape: f32[8,1], index: 3, kind: input, shape index: {}]   ;;  %s1160_s4 = inlined_call_operand.hbm [shape: f32[8,256], index: 4, kind: output, shape index: {}]  }
   0x1   :  { %10 = vsyncpa [#allocation6], 0  ;;  %s1016_s15 = smov 0   ;;  %s1018_s16 = smov 0  }
   0x2   :  { %s1020_s17 = smov 0  }
   0x3 LB: > { %s733_s18 = sadd.s32 4294967295, %s982_s17   ;;  %s35_s19 = sadd.s32 1, %s978_s16  ;;  %s982_s17 = sphi %s1020_s17, %s16_s17   ;;  %s978_s16 = sphi %s1018_s16, %s1171_s16   ;;  %s974_s15 = sphi %s1016_s15, %s1170_s15  }
   0x4   : > { %p37_p0 = scmp.ge.s32.totalorder %s35_s19, 2  ;;  %p734_p1 = scmp.ge.s32.totalorder %s982_s17, 1 }
   0x5   : > { %p152_p2 = scmp.lt.s32.totalorder %s982_s17, 3  ;;  %p1043_p4 = scmp.eq.s32.totalorder %s733_s18, 0 }
   0x6   : > { %s1173_s19 = smov (%p37_p0, %s35_s19), 0  ;;  %s984_s22 = smov [#allocation4]  }
   0x7   : > { %p1037_p3 = pnand %p734_p1, %p152_p2  ;;  %s170_s23 = sshll.u32 %s984_s22, 4  ;;  %s171_s23 = int_to_ptr.vmem [resolvable:$true] %s170_s23 }
   0x8   : > { %s1165_s21 = scalar_select %p1043_p4, 1, 0 }
   0x9   : > { %s1164_s20 = scalar_select %p1037_p3, 1, 0 }
   0xa   : > { %p851_p5 = pneg %p1037_p3  ;;  %s898_s27 = scalar_lea.hbm %s1156_s0, 8192 }
   0xb   : > { %p899_p7 = scmp.ne.s32.totalorder %s1156_s0, %s898_s27  ;;  %p905_p11 = scmp.lt.u32.totalorder %s898_s27, %s1156_s0 }
   0xc   : > { %p1051_p6 = pnand %p1043_p4, %p851_p5 }
   0xe   : > { %p900_p8 = pneg %p1051_p6 }
  0x10   : > { %p901_p9 = pnand %p900_p8, %p899_p7 }
  0x12   : > { %p902_p10 = pneg %p901_p9 }
  0x14   : > { %p907_p12 = pnand %p905_p11, %p902_p10 }
  0x16   : > { %910 = shalt.err (!%p907_p12)
}
  0x17   : > { %s911_s6 = scalar_lea.vmem %s171_s23, 8192  ;;  %p919_p2 = scmp.lt.s32.totalorder %s171_s23, %s171_s23 }
  0x18   : > { %p912_p13 = scmp.ne.s32.totalorder %s171_s23, %s911_s6  ;;  %p920_p5 = scmp.lt.s32.totalorder %s911_s6, %s911_s6 }
  0x1a   : > { %p914_p0 = pnand %p912_p13, %p900_p8  ;;  %p921_p4 = por %p920_p5, %p919_p2 }
  0x1c   : > { %p915_p1 = pneg %p914_p0 }
  0x1e   : > { %p922_p3 = pnand %p921_p4, %p915_p1 }
  0x20   : > { %925 = shalt.err (!%p922_p3)
}
  0x21   : > { %s985_s7 = smov 256   ;;  %s986_s8 = smov 16  }
  0x22   : > { %854 = dma.hbm_to_vmem [thread:$0]  (!%p1051_p6), %s1156_s0, 8192, %s171_s23, [#allocation5], %s985_s7, %s985_s7, %s986_s8  }
  0x23   : > { %p1167_p7 = scmp.ne.s32.totalorder %s1164_s20, 0 }
  0x24   : > { %p1168_p9 = scmp.ne.s32.totalorder (!%p1167_p7), %s1165_s21, 0 }
  0x25   : > { %195 = sbr.rel (%p1167_p7) target bundleno = 655 (0x28f), region = 36 }
  0x2c   : > { %965 = dma.done.wait (%p1168_p9), [#allocation5], 8192  }
  0x2d   : > { %967 = vsyncadd (%p1168_p9), [#allocation5], 4294959104  ;;  %p213_p4 = scmp.eq.s32.totalorder %s974_s15, 0 }
  0x2e   : > { %v222_v0 = vld [vmem:[%s1157_s1] sm:$0xff] (%p213_p4)  ;;  %v223_v1 = vld [vmem:[%s1157_s1 + $0x8] sm:$0xff] (%p213_p4) }
  0x2f   : > { %221 = sbr.rel (!%p213_p4) target bundleno = 54 (0x36), region = 44  ;;  %224 = vst [vmem:[#allocation2] sm:$0xff] (%p213_p4), %v222_v0  ;;  %225 = vst [vmem:[#allocation2 + $0x8] sm:$0xff] (%p213_p4), %v223_v1 }
  0x36 PF: > { %v259_v2 = vld [vmem:[#allocation4 + $0x8] sm:$0xff]  ;;  %v261_v3 = vld [vmem:[#allocation4 + $0x18] sm:$0xff]  ;;  %v258_v4 = vld [vmem:[#allocation4] sm:$0xff]  ;;  %s233_s20 = ssub.s32 0, %s974_s15  ;;  %s1087_s22 = sadd.s32 1, %s974_s15  ;;  %vm467_vm0 = vcmask 64512  }
  0x37   : > { %v779_v5 = vpack.c.bf16 %v261_v3, %v259_v2  ;;  %v260_v6 = vld [vmem:[#allocation4 + $0x10] sm:$0xff]  ;;  %v263_v7 = vld [vmem:[#allocation4 + $0x28] sm:$0xff]  ;;  %v265_v8 = vld [vmem:[#allocation4 + $0x38] sm:$0xff]  ;;  %s740_s21 = smin.u32 %s974_s15, %s233_s20  ;;  %s420_s23 = ssub.s32 0, %s1087_s22 }
  0x38   : > { %v781_v9 = vpack.c.bf16 %v260_v6, %v258_v4  ;;  %v783_v10 = vpack.c.bf16 %v265_v8, %v263_v7  ;;  %891 = sdivrem.u32 %s740_s21, 3  ;;  %s756_s24 = smin.u32 %s420_s23, %s1087_s22  ;;  %v262_v11 = vld [vmem:[#allocation4 + $0x20] sm:$0xff]  ;;  %v264_v12 = vld [vmem:[#allocation4 + $0x30] sm:$0xff]  ;;  %v267_v13 = vld [vmem:[#allocation4 + $0x48] sm:$0xff] }
  0x39   : > { %780 = vmatprep.subr.bf16.mxu0 %v779_v5  ;;  %893 = sdivrem.u32 %s756_s24, 3  ;;  %v269_v14 = vld [vmem:[#allocation4 + $0x58] sm:$0xff]  ;;  %v785_v15 = vpack.c.bf16 %v264_v12, %v262_v11  ;;  %p232_p3 = scmp.lt.s32.totalorder %s974_s15, 0  ;;  %v266_v17 = vld [vmem:[#allocation4 + $0x40] sm:$0xff]  ;;  %v268_v18 = vld [vmem:[#allocation4 + $0x50] sm:$0xff] }
  0x3a   : > { %782 = vmatpush1.bf16.xpose.msra.mxu0 %v781_v9  ;;  %v787_v16 = vpack.c.bf16 %v269_v14, %v267_v13  ;;  %v271_v19 = vld [vmem:[#allocation4 + $0x68] sm:$0xff]  ;;  %v273_v20 = vld [vmem:[#allocation4 + $0x78] sm:$0xff]  ;;  %v789_v21 = vpack.c.bf16 %v268_v18, %v266_v17  ;;  %v270_v23 = vld [vmem:[#allocation4 + $0x60] sm:$0xff]  ;;  %s746_s6 = sadd.s32 4294967295, %s974_s15  ;;  %p419_p10 = scmp.lt.s32.totalorder %s1087_s22, 0 }
  0x3b   : > { %784 = vmatprep.subr.bf16.mxu0 %v783_v10  ;;  %v791_v22 = vpack.c.bf16 %v273_v20, %v271_v19  ;;  %v272_v24 = vld [vmem:[#allocation4 + $0x70] sm:$0xff]  ;;  %v275_v25 = vld [vmem:[#allocation4 + $0x88] sm:$0xff]  ;;  %v277_v26 = vld [vmem:[#allocation4 + $0x98] sm:$0xff]  ;;  %p402_p8 = scmp.gt.s32.totalorder %s746_s6, 0  ;;  %p443_p12 = scmp.gt.s32.totalorder %s974_s15, 0 }
  0x3c   : > { %v793_v28 = vpack.c.bf16 %v272_v24, %v270_v23  ;;  %v795_v29 = vpack.c.bf16 %v277_v26, %v275_v25  ;;  %v274_v30 = vld [vmem:[#allocation4 + $0x80] sm:$0xff]  ;;  %v276_v31 = vld [vmem:[#allocation4 + $0x90] sm:$0xff]  ;;  %v279_v32 = vld [vmem:[#allocation4 + $0xa8] sm:$0xff]  ;;  %s764_s22 = sshll.u32 %s974_s15, 3  ;;  %p767_p13 = scmp.ne.s32.totalorder %s974_s15, 0 }
  0x3d   : > { %v281_v33 = vld [vmem:[#allocation4 + $0xb8] sm:$0xff]  ;;  %v797_v34 = vpack.c.bf16 %v276_v31, %v274_v30  ;;  %v278_v36 = vld [vmem:[#allocation4 + $0xa0] sm:$0xff]  ;;  %v280_v37 = vld [vmem:[#allocation4 + $0xb0] sm:$0xff]  ;;  %s1179_s6 = smov (!%p402_p8, %s746_s6), 0 }
  0x3e   : > { %v799_v35 = vpack.c.bf16 %v281_v33, %v279_v32  ;;  %v283_v38 = vld [vmem:[#allocation4 + $0xc8] sm:$0xff]  ;;  %v285_v39 = vld [vmem:[#allocation4 + $0xd8] sm:$0xff]  ;;  %v801_v40 = vpack.c.bf16 %v280_v37, %v278_v36  ;;  %v282_v42 = vld [vmem:[#allocation4 + $0xc0] sm:$0xff]  ;;  %895 = sdivrem.u32 %s1179_s6, 3  ;;  %v987_v36 = vmov 0.0  }
  0x3f   : > { %v803_v41 = vpack.c.bf16 %v285_v39, %v283_v38  ;;  %v284_v43 = vld [vmem:[#allocation4 + $0xd0] sm:$0xff]  ;;  %v287_v44 = vld [vmem:[#allocation4 + $0xe8] sm:$0xff]  ;;  %v289_v45 = vld [vmem:[#allocation4 + $0xf8] sm:$0xff]  ;;  %535 = vmatprep.mubr.f32.mxu1 %v987_v36  ;;  %s445_s14 = scalar_select %p443_p12, 1.0, 0.0 }
  0x40   : > { %v805_v46 = vpack.c.bf16 %v284_v43, %v282_v42  ;;  %v807_v47 = vpack.c.bf16 %v289_v45, %v287_v44  ;;  %v286_v48 = vld [vmem:[#allocation4 + $0xe0] sm:$0xff]  ;;  %v288_v49 = vld [vmem:[#allocation4 + $0xf0] sm:$0xff]  ;;  %v291_v50 = vld [vmem:[#allocation4 + $0x108] sm:$0xff]  ;;  %s444_s20 = scalar_select %p443_p12, 2.0, 1.0 }
  0x41   : > { %s892_s25 = spop.drf %891  ;;  %v293_v51 = vld [vmem:[#allocation4 + $0x118] sm:$0xff]  ;;  %v809_v52 = vpack.c.bf16 %v288_v49, %v286_v48  ;;  %v290_v54 = vld [vmem:[#allocation4 + $0x100] sm:$0xff]  ;;  %v292_v55 = vld [vmem:[#allocation4 + $0x110] sm:$0xff]  ;;  %v451_v37 = vstv %s445_s14 }
  0x42   : > { %786 = vmatpush1.bf16.xpose.msra.mxu0 %v785_v15  ;;  %s237_s26 = ssub.s32 0, %s892_s25  ;;  %v811_v53 = vpack.c.bf16 %v293_v51, %v291_v50  ;;  %v295_v56 = vld [vmem:[#allocation4 + $0x128] sm:$0xff]  ;;  %v297_v57 = vld [vmem:[#allocation4 + $0x138] sm:$0xff]  ;;  %v813_v58 = vpack.c.bf16 %v292_v55, %v290_v54  ;;  %v294_v60 = vld [vmem:[#allocation4 + $0x120] sm:$0xff]  ;;  %s894_s7 = spop.drf %893  ;;  %v988_v55 = vmov (!%p767_p13), 0.0  }
  0x43   : > { %788 = vmatprep.subr.bf16.mxu0 %v787_v16  ;;  %s1175_s26 = smov (!%p232_p3, %s237_s26), %s892_s25  ;;  %v815_v59 = vpack.c.bf16 %v297_v57, %v295_v56  ;;  %v296_v61 = vld [vmem:[#allocation4 + $0x130] sm:$0xff]  ;;  %v299_v62 = vld [vmem:[#allocation4 + $0x148] sm:$0xff]  ;;  %v301_v63 = vld [vmem:[#allocation4 + $0x158] sm:$0xff]  ;;  %s424_s9 = ssub.s32 0, %s894_s7  ;;  %v989_v57 = vmov (!%p767_p13), 0  }
  0x44   : > { %p742_p6 = scmp.lt.s32.totalorder %s1175_s26, 0  ;;  %s243_s27 = sadd.s32 3, %s1175_s26  ;;  %v817_v0 = vpack.c.bf16 %v296_v61, %v294_v60  ;;  %v819_v1 = vpack.c.bf16 %v301_v63, %v299_v62  ;;  %v298_v2 = vld [vmem:[#allocation4 + $0x140] sm:$0xff]  ;;  %v300_v3 = vld [vmem:[#allocation4 + $0x150] sm:$0xff]  ;;  %v303_v4 = vld [vmem:[#allocation4 + $0x168] sm:$0xff]  ;;  %897 = vset.pattern.permute.xlu0 (!%p767_p13), %v989_v57 }
  0x45   : > { %v305_v5 = vld [vmem:[#allocation4 + $0x178] sm:$0xff]  ;;  %v821_v6 = vpack.c.bf16 %v300_v3, %v298_v2  ;;  %v302_v8 = vld [vmem:[#allocation4 + $0x160] sm:$0xff]  ;;  %v304_v9 = vld [vmem:[#allocation4 + $0x170] sm:$0xff]  ;;  %s1181_s9 = smov (!%p419_p10, %s424_s9), %s894_s7 }
  0x46   : > { %s1177_s27 = smov (!%p742_p6, %s243_s27), %s1175_s26  ;;  %v823_v7 = vpack.c.bf16 %v305_v5, %v303_v4  ;;  %v307_v10 = vld [vmem:[#allocation4 + $0x188] sm:$0xff]  ;;  %v309_v11 = vld [vmem:[#allocation4 + $0x198] sm:$0xff]  ;;  %v825_v12 = vpack.c.bf16 %v304_v9, %v302_v8  ;;  %v306_v14 = vld [vmem:[#allocation4 + $0x180] sm:$0xff]  ;;  %p758_p11 = scmp.lt.s32.totalorder %s1181_s9, 0 }
  0x47   : > { %s743_s28 = sshll.u32 %s1177_s27, 3  ;;  %v827_v13 = vpack.c.bf16 %v309_v11, %v307_v10  ;;  %v308_v15 = vld [vmem:[#allocation4 + $0x190] sm:$0xff]  ;;  %v311_v16 = vld [vmem:[#allocation4 + $0x1a8] sm:$0xff]  ;;  %v313_v17 = vld [vmem:[#allocation4 + $0x1b8] sm:$0xff]  ;;  %s896_s8 = spop.drf %895 }
  0x48   : > { %s248_s29 = sshra.s32 %s743_s28, 3  ;;  %v829_v18 = vpack.c.bf16 %v308_v15, %v306_v14  ;;  %v831_v19 = vpack.c.bf16 %v313_v17, %v311_v16  ;;  %v310_v20 = vld [vmem:[#allocation4 + $0x1a0] sm:$0xff]  ;;  %v317_v23 = vld [vmem:[#allocation4 + $0x1d8] sm:$0xff]  ;;  %v320_v33 = vld [vmem:[#allocation4 + $0x1f0] sm:$0xff]  ;;  %s755_s10 = sshll.u32 %s896_s8, 3 }
  0x49   : > { %s776_s30 = sshll.u32 %s248_s29, 4  ;;  %v314_v26 = vld [vmem:[#allocation4 + $0x1c0] sm:$0xff]  ;;  %s435_s11 = sshra.s32 %s755_s10, 3  ;;  %v545_v54 = vld [vmem:[%s1158_s2] sm:$0xff] (!%p767_p13) }
  0x4a   : > { %790 = vmatpush1.bf16.xpose.msra.mxu0 %v789_v21  ;;  %s1092_s5 = scalar_lea.vmem [#allocation2], %s776_s30  ;;  %v312_v21 = vld [vmem:[#allocation4 + $0x1b0] sm:$0xff]  ;;  %v318_v32 = vld [vmem:[#allocation4 + $0x1e0] sm:$0xff]  ;;  %s430_s12 = sadd.s32 3, %s1181_s9 }
  0x4b   : > { %792 = vmatprep.subr.bf16.mxu0 %v791_v22  ;;  %v255_v27 = vld [vmem:[%s1092_s5 + $0x8] sm:$0xff]  ;;  %v315_v22 = vld [vmem:[#allocation4 + $0x1c8] sm:$0xff]  ;;  %v833_v24 = vpack.c.bf16 %v312_v21, %v310_v20  ;;  %s777_s13 = sshll.u32 %s435_s11, 4  ;;  %s1183_s12 = smov (!%p758_p11, %s430_s12), %s1181_s9  ;;  %v546_v56 = vld [vmem:[%s1159_s3] sm:$0xff] (!%p767_p13) }
  0x4c   : > { %386 = vmatprep.mubr.f32.mxu0 %v255_v27  ;;  %v835_v25 = vpack.c.bf16 %v317_v23, %v315_v22  ;;  %v316_v27 = vld [vmem:[#allocation4 + $0x1d0] sm:$0xff]  ;;  %s759_s21 = sshll.u32 %s1183_s12, 3  ;;  %s440_s23 = scalar_lea.vmem [#allocation2], %s777_s13  ;;  %627 = vperm.xlu0 (!%p767_p13), %897, %v546_v56  }
  0x4d   : > { %v837_v30 = vpack.c.bf16 %v316_v27, %v314_v26  ;;  %v441_v38 = vld [vmem:[%s440_s23] sm:$0xff]  ;;  %v442_v39 = vld [vmem:[%s440_s23 + $0x8] sm:$0xff]  ;;  %s456_s24 = sshra.s32 %s759_s21, 3  ;;  %s693_s28 = scalar_lea.vmem %s1158_s2, %s764_s22 }
  0x4e   : > { %v453_v43 = vmul.f32 %v451_v37, %v442_v39  ;;  %s778_s25 = sshll.u32 %s456_s24, 4  ;;  %v765_v49 = vld [vmem:[%s693_s28 + $0x8] sm:$0xff] }
  0x4f   : > { %s461_s29 = scalar_lea.vmem [#allocation2], %s778_s25 }
  0x52   : > { %794 = vmatpush1.bf16.xpose.msra.mxu0 %v793_v28  ;;  %v319_v28 = vld [vmem:[#allocation4 + $0x1e8] sm:$0xff] }
  0x53   : > { %796 = vmatprep.subr.bf16.mxu0 %v795_v29  ;;  %v321_v29 = vld [vmem:[#allocation4 + $0x1f8] sm:$0xff] }
  0x54   : > { %v839_v31 = vpack.c.bf16 %v321_v29, %v319_v28 }
  0x5a   : > { %798 = vmatpush1.bf16.xpose.msra.mxu0 %v797_v34  ;;  %v841_v34 = vpack.c.bf16 %v320_v33, %v318_v32 }
  0x5b   : > { %800 = vmatprep.subr.bf16.mxu0 %v799_v35  ;;  %v254_v35 = vld [vmem:[%s1092_s5] sm:$0xff] }
  0x62   : > { %802 = vmatpush1.bf16.xpose.msra.mxu0 %v801_v40  ;;  %v448_v40 = vstv %s444_s20 }
  0x63   : > { %804 = vmatprep.subr.bf16.mxu0 %v803_v41  ;;  %v452_v41 = vmul.f32 %v451_v37, %v441_v38 }
  0x6a   : > { %806 = vmatpush1.bf16.xpose.msra.mxu0 %v805_v46 }
  0x6b   : > { %808 = vmatprep.subr.bf16.mxu0 %v807_v47 }
  0x72   : > { %810 = vmatpush1.bf16.xpose.msra.mxu0 %v809_v52  ;;  %v550_v52 = vld [vmem:[%s1157_s1 + $0x8] sm:$0xff] (!%p767_p13) }
  0x73   : > { %812 = vmatprep.subr.bf16.mxu0 %v811_v53  ;;  %v549_v53 = vld [vmem:[%s1157_s1] sm:$0xff] (!%p767_p13) }
  0x7a   : > { %814 = vmatpush1.bf16.xpose.msra.mxu0 %v813_v58 }
  0x7b   : > { %816 = vmatprep.subr.bf16.mxu0 %v815_v59 }
  0x82   : > { %818 = vmatpush1.bf16.xpose.msra.mxu0 %v817_v0 }
  0x83   : > { %820 = vmatprep.subr.bf16.mxu0 %v819_v1 }
  0x8a   : > { %822 = vmatpush1.bf16.xpose.msra.mxu0 %v821_v6 }
  0x8b   : > { %824 = vmatprep.subr.bf16.mxu0 %v823_v7 }
  0x92   : > { %826 = vmatpush1.bf16.xpose.msra.mxu0 %v825_v12 }
  0x93   : > { %828 = vmatprep.subr.bf16.mxu0 %v827_v13 }
  0x9a   : > { %830 = vmatpush1.bf16.xpose.msra.mxu0 %v829_v18 }
  0x9b   : > { %832 = vmatprep.subr.bf16.mxu0 %v831_v19 }
  0xa2   : > { %834 = vmatpush1.bf16.xpose.msra.mxu0 %v833_v24 }
  0xa3   : > { %836 = vmatprep.subr.bf16.mxu0 %v835_v25 }
  0xaa   : > { %838 = vmatpush1.bf16.xpose.msra.mxu0 %v837_v30 }
  0xab   : > { %840 = vmatprep.subr.bf16.mxu0 %v839_v31 }
  0xb2   : > { %842 = vmatpush1.bf16.xpose.msra.mxu0 %v841_v34 }
  0xb3   : > { %554 = vmatprep.subr.mxu0 (!%p767_p13), %v550_v52 }
  0xb9   : > { %387 = vmatmul.mubr.f32.vlgmr.msra.gmra.mrb[0].mxu0 %v254_v35 }
  0xba   : > { %618 = vmatprep.mubr.f32.mxu0 (!%p767_p13), %v988_v55  ;;  %555 = vmatpush1.msra.mxu0 (!%p767_p13), %v549_v53 }
  0xcb   : > { %v628_v58 = vpop.permute.xlu0 (!%p767_p13), %627 }
 0x18c   : > { %v388_v42 = vpop.f32.mrb[0].mxu0 }
 0x18d   : > { %v449_v44 = vmul.f32 %v448_v40, %v388_v42  ;;  %v390_v45 = vpop.f32.mrb[1].mxu0  ;;  %768 = vmatmul.mubr.msk.f32.vlgmr.msra.gmra.mrb[0].mxu0 (!%p767_p13), %vm467_vm0, %v545_v54 }
 0x18e   : > { %v450_v46 = vmul.f32 %v448_v40, %v390_v45 }
 0x18f   : > { %v454_v47 = vsub.f32 %v449_v44, %v452_v41 }
 0x190   : > { %v455_v48 = vsub.f32 %v450_v46, %v453_v43 }
 0x191   : > { %462 = vst [vmem:[%s461_s29] sm:$0xff] %v454_v47 }
 0x192   : > { %471 = vmatprep.subr.mxu1 %v455_v48  ;;  %463 = vst [vmem:[%s461_s29 + $0x8] sm:$0xff] %v455_v48 }
 0x193   : > { %472 = vmatpush1.msra.mxu1 %v454_v47 }
 0x194   : > { %766 = vmatmul.mubr.msk.f32.vlgmr.msra.gmra.mrb[0].mxu1 %vm467_vm0, %v765_v49 }
 0x260   : > { %v620_v59 = vpop.f32.mrb[0].mxu0 (!%p767_p13) }
 0x261   : > { %v630_v60 = vadd.f32 (!%p767_p13), %v628_v58, %v620_v59  ;;  %v622_v61 = vpop.f32.mrb[1].mxu0 (!%p767_p13) }
 0x262   : > { %544 = sbr.rel (%p767_p13) target bundleno = 620 (0x26c), region = 56  ;;  %v631_v62 = vadd.f32 (!%p767_p13), %v628_v58, %v622_v61 }
 0x267   : > { %v537_v50 = vpop.f32.mrb[0].mxu1 }
 0x268   : > { %v539_v51 = vpop.f32.mrb[1].mxu1  ;;  %v632_v63 = vadd.f32 (!%p767_p13), %v630_v60, %v537_v50 }
 0x269   : > { %v633_v0 = vadd.f32 %v631_v62, %v539_v51 }
 0x26a   : > { %636 = vst [vmem:[#allocation7] sm:$0xff] %v632_v63 }
 0x26b   : > { %637 = vst [vmem:[#allocation7 + $0x8] sm:$0xff] %v633_v0 }
 0x26c PF: > { %p769_p0 = scmp.le.s32.totalorder %s974_s15, 0 }
 0x26e   : > { %640 = sbr.rel (%p769_p0) target bundleno = 630 (0x276), region = 60 }
 0x271   : > { %v643_v1 = vld [vmem:[#allocation7] sm:$0xff] (!%p769_p0) }
 0x272   : > { %v644_v2 = vld [vmem:[#allocation7 + $0x8] sm:$0xff] (!%p769_p0)  ;;  %v645_v3 = vadd.f32 (!%p769_p0), %v643_v1, %v537_v50 }
 0x273   : > { %v646_v4 = vadd.f32 (!%p769_p0), %v644_v2, %v539_v51 }
 0x274   : > { %647 = vst [vmem:[#allocation7] sm:$0xff] (!%p769_p0), %v645_v3 }
 0x275   : > { %648 = vst [vmem:[#allocation7 + $0x8] sm:$0xff] %v646_v4 }
 0x276 PF: > { %p1121_p1 = scmp.eq.s32.totalorder %s733_s18, 1  ;;  %s990_s13 = smov [#allocation7]  }
 0x277   : > { %s656_s14 = sshll.u32 %s990_s13, 4  ;;  %s657_s14 = int_to_ptr.vmem [resolvable:$true] %s656_s14 }
 0x278   : > { %s926_s20 = scalar_lea.vmem %s657_s14, 256  ;;  %p933_p9 = scmp.lt.s32.totalorder %s657_s14, %s657_s14 }
 0x279   : > { %p927_p2 = scmp.ne.s32.totalorder %s657_s14, %s926_s20  ;;  %p934_p4 = scmp.lt.s32.totalorder %s926_s20, %s926_s20 }
 0x27b   : > { %p928_p5 = pnand %p927_p2, %p1121_p1  ;;  %p935_p3 = por %p934_p4, %p933_p9 }
 0x27d   : > { %p929_p7 = pneg %p928_p5 }
 0x27f   : > { %p936_p6 = pnand %p935_p3, %p929_p7 }
 0x281   : > { %939 = shalt.err (!%p936_p6)
}
 0x282   : > { %s940_s18 = scalar_lea.hbm %s1160_s4, 256 }
 0x283   : > { %p941_p8 = scmp.ne.s32.totalorder %s1160_s4, %s940_s18  ;;  %p946_p12 = scmp.lt.u32.totalorder %s940_s18, %s1160_s4 }
 0x285   : > { %p942_p10 = pnand %p941_p8, %p1121_p1 }
 0x287   : > { %p943_p11 = pneg %p942_p10 }
 0x289   : > { %p948_p13 = pnand %p946_p12, %p943_p11 }
 0x28b   : > { %951 = shalt.err (!%p948_p13)
}
 0x28c   : > { %848 = dma.vmem_to_hbm [thread:$0]  (%p1121_p1), %s657_s14, 256, %s1160_s4, [#allocation6]  }
 0x28d   : > { %969 = dma.done.wait (%p1121_p1), [#allocation6], 256  }
 0x28e   : > { %971 = vsyncadd (%p1121_p1), [#allocation6], 4294967040 }
 0x28f PF: > { %s16_s17 = sadd.s32 1, %s982_s17   ;;  %s1170_s15 = smov %s978_s16 }
 0x290   : > { %p13_p0 = scmp.ge.s32.totalorder %s16_s17, 4   ;;  %s1171_s16 = smov %s1173_s19 }
 0x292   :  { %15 = sbr.rel (!%p13_p0) target bundleno = 3 (0x3), region = 93 }
 0x299   :  { %669 = vsyncpa [#allocation5], 1 }
 0x29a   :  { %671 = vsyncpa [#allocation5 + $0x1], 1 }
 0x29b   :  { %672 = vsyncpa [#allocation6], 1 }
 0x29c   :  { %674 = vsyncpa [#allocation6 + $0x1], 1 }

// kernel: tpu_custom_call.1
= control target key start
LH: loop header
LB: loop body
LE: loop exit
PB: predicated region body
PF: predicated region fallthrough
CT: control target
= control target key end

     0   :  { %9 = vsyncpa [#allocation5], 0  ;;  %s1156_s0 = inlined_call_operand.hbm [shape: f32[256,256], index: 0, kind: input, shape index: {}]   ;;  %s1157_s1 = inlined_call_operand.vmem [shape: f32[8,256], index: 1, kind: input, shape index: {}]   ;;  %s1158_s2 = inlined_call_operand.vmem [shape: f32[24,8], index: 2, kind: input, shape index: {}]   ;;  %s1159_s3 = inlined_call_operand.vmem [shape: f32[8,1], index: 3, kind: input, shape index: {}]   ;;  %s1160_s4 = inlined_call_operand.hbm [shape: f32[8,256], index: 4, kind: output, shape index: {}]  }
   0x1   :  { %10 = vsyncpa [#allocation6], 0  ;;  %s1016_s15 = smov 0   ;;  %s1018_s16 = smov 0  }
   0x2   :  { %s1020_s17 = smov 0  }
   0x3 LB: > { %s733_s18 = sadd.s32 4294967295, %s982_s17   ;;  %s35_s19 = sadd.s32 1, %s978_s16  ;;  %s982_s17 = sphi %s1020_s17, %s16_s17   ;;  %s978_s16 = sphi %s1018_s16, %s1171_s16   ;;  %s974_s15 = sphi %s1016_s15, %s1170_s15  }
   0x4   : > { %p37_p0 = scmp.ge.s32.totalorder %s35_s19, 2  ;;  %p734_p1 = scmp.ge.s32.totalorder %s982_s17, 1 }
   0x5   : > { %p152_p2 = scmp.lt.s32.totalorder %s982_s17, 3  ;;  %p1043_p4 = scmp.eq.s32.totalorder %s733_s18, 0 }
   0x6   : > { %s1173_s19 = smov (%p37_p0, %s35_s19), 0  ;;  %s984_s22 = smov [#allocation4]  }
   0x7   : > { %p1037_p3 = pnand %p734_p1, %p152_p2  ;;  %s170_s23 = sshll.u32 %s984_s22, 4  ;;  %s171_s23 = int_to_ptr.vmem [resolvable:$true] %s170_s23 }
   0x8   : > { %s1165_s21 = scalar_select %p1043_p4, 1, 0 }
   0x9   : > { %s1164_s20 = scalar_select %p1037_p3, 1, 0 }
   0xa   : > { %p851_p5 = pneg %p1037_p3  ;;  %s898_s27 = scalar_lea.hbm %s1156_s0, 8192 }
   0xb   : > { %p899_p7 = scmp.ne.s32.totalorder %s1156_s0, %s898_s27  ;;  %p905_p11 = scmp.lt.u32.totalorder %s898_s27, %s1156_s0 }
   0xc   : > { %p1051_p6 = pnand %p1043_p4, %p851_p5 }
   0xe   : > { %p900_p8 = pneg %p1051_p6 }
  0x10   : > { %p901_p9 = pnand %p900_p8, %p899_p7 }
  0x12   : > { %p902_p10 = pneg %p901_p9 }
  0x14   : > { %p907_p12 = pnand %p905_p11, %p902_p10 }
  0x16   : > { %910 = shalt.err (!%p907_p12)
}
  0x17   : > { %s911_s6 = scalar_lea.vmem %s171_s23, 8192  ;;  %p919_p2 = scmp.lt.s32.totalorder %s171_s23, %s171_s23 }
  0x18   : > { %p912_p13 = scmp.ne.s32.totalorder %s171_s23, %s911_s6  ;;  %p920_p5 = scmp.lt.s32.totalorder %s911_s6, %s911_s6 }
  0x1a   : > { %p914_p0 = pnand %p912_p13, %p900_p8  ;;  %p921_p4 = por %p920_p5, %p919_p2 }
  0x1c   : > { %p915_p1 = pneg %p914_p0 }
  0x1e   : > { %p922_p3 = pnand %p921_p4, %p915_p1 }
  0x20   : > { %925 = shalt.err (!%p922_p3)
}
  0x21   : > { %s985_s7 = smov 256   ;;  %s986_s8 = smov 16  }
  0x22   : > { %854 = dma.hbm_to_vmem [thread:$0]  (!%p1051_p6), %s1156_s0, 8192, %s171_s23, [#allocation5], %s985_s7, %s985_s7, %s986_s8  }
  0x23   : > { %p1167_p7 = scmp.ne.s32.totalorder %s1164_s20, 0 }
  0x24   : > { %p1168_p9 = scmp.ne.s32.totalorder (!%p1167_p7), %s1165_s21, 0 }
  0x25   : > { %195 = sbr.rel (%p1167_p7) target bundleno = 655 (0x28f), region = 36 }
  0x2c   : > { %965 = dma.done.wait (%p1168_p9), [#allocation5], 8192  }
  0x2d   : > { %967 = vsyncadd (%p1168_p9), [#allocation5], 4294959104  ;;  %p213_p4 = scmp.eq.s32.totalorder %s974_s15, 0 }
  0x2e   : > { %v222_v0 = vld [vmem:[%s1157_s1] sm:$0xff] (%p213_p4)  ;;  %v223_v1 = vld [vmem:[%s1157_s1 + $0x8] sm:$0xff] (%p213_p4) }
  0x2f   : > { %221 = sbr.rel (!%p213_p4) target bundleno = 54 (0x36), region = 44  ;;  %224 = vst [vmem:[#allocation2] sm:$0xff] (%p213_p4), %v222_v0  ;;  %225 = vst [vmem:[#allocation2 + $0x8] sm:$0xff] (%p213_p4), %v223_v1 }
  0x36 PF: > { %v259_v2 = vld [vmem:[#allocation4 + $0x8] sm:$0xff]  ;;  %v261_v3 = vld [vmem:[#allocation4 + $0x18] sm:$0xff]  ;;  %v258_v4 = vld [vmem:[#allocation4] sm:$0xff]  ;;  %s233_s20 = ssub.s32 0, %s974_s15  ;;  %s1087_s22 = sadd.s32 1, %s974_s15  ;;  %vm467_vm0 = vcmask 64512  }
  0x37   : > { %v779_v5 = vpack.c.bf16 %v261_v3, %v259_v2  ;;  %v260_v6 = vld [vmem:[#allocation4 + $0x10] sm:$0xff]  ;;  %v263_v7 = vld [vmem:[#allocation4 + $0x28] sm:$0xff]  ;;  %v265_v8 = vld [vmem:[#allocation4 + $0x38] sm:$0xff]  ;;  %s740_s21 = smin.u32 %s974_s15, %s233_s20  ;;  %s420_s23 = ssub.s32 0, %s1087_s22 }
  0x38   : > { %v781_v9 = vpack.c.bf16 %v260_v6, %v258_v4  ;;  %v783_v10 = vpack.c.bf16 %v265_v8, %v263_v7  ;;  %891 = sdivrem.u32 %s740_s21, 3  ;;  %s756_s24 = smin.u32 %s420_s23, %s1087_s22  ;;  %v262_v11 = vld [vmem:[#allocation4 + $0x20] sm:$0xff]  ;;  %v264_v12 = vld [vmem:[#allocation4 + $0x30] sm:$0xff]  ;;  %v267_v13 = vld [vmem:[#allocation4 + $0x48] sm:$0xff] }
  0x39   : > { %780 = vmatprep.subr.bf16.mxu0 %v779_v5  ;;  %893 = sdivrem.u32 %s756_s24, 3  ;;  %v269_v14 = vld [vmem:[#allocation4 + $0x58] sm:$0xff]  ;;  %v785_v15 = vpack.c.bf16 %v264_v12, %v262_v11  ;;  %p232_p3 = scmp.lt.s32.totalorder %s974_s15, 0  ;;  %v266_v17 = vld [vmem:[#allocation4 + $0x40] sm:$0xff]  ;;  %v268_v18 = vld [vmem:[#allocation4 + $0x50] sm:$0xff] }
  0x3a   : > { %782 = vmatpush1.bf16.xpose.msra.mxu0 %v781_v9  ;;  %v787_v16 = vpack.c.bf16 %v269_v14, %v267_v13  ;;  %v271_v19 = vld [vmem:[#allocation4 + $0x68] sm:$0xff]  ;;  %v273_v20 = vld [vmem:[#allocation4 + $0x78] sm:$0xff]  ;;  %v789_v21 = vpack.c.bf16 %v268_v18, %v266_v17  ;;  %v270_v23 = vld [vmem:[#allocation4 + $0x60] sm:$0xff]  ;;  %s746_s6 = sadd.s32 4294967295, %s974_s15  ;;  %p419_p10 = scmp.lt.s32.totalorder %s1087_s22, 0 }
  0x3b   : > { %784 = vmatprep.subr.bf16.mxu0 %v783_v10  ;;  %v791_v22 = vpack.c.bf16 %v273_v20, %v271_v19  ;;  %v272_v24 = vld [vmem:[#allocation4 + $0x70] sm:$0xff]  ;;  %v275_v25 = vld [vmem:[#allocation4 + $0x88] sm:$0xff]  ;;  %v277_v26 = vld [vmem:[#allocation4 + $0x98] sm:$0xff]  ;;  %p402_p8 = scmp.gt.s32.totalorder %s746_s6, 0  ;;  %p443_p12 = scmp.gt.s32.totalorder %s974_s15, 0 }
  0x3c   : > { %v793_v28 = vpack.c.bf16 %v272_v24, %v270_v23  ;;  %v795_v29 = vpack.c.bf16 %v277_v26, %v275_v25  ;;  %v274_v30 = vld [vmem:[#allocation4 + $0x80] sm:$0xff]  ;;  %v276_v31 = vld [vmem:[#allocation4 + $0x90] sm:$0xff]  ;;  %v279_v32 = vld [vmem:[#allocation4 + $0xa8] sm:$0xff]  ;;  %s764_s22 = sshll.u32 %s974_s15, 3  ;;  %p767_p13 = scmp.ne.s32.totalorder %s974_s15, 0 }
  0x3d   : > { %v281_v33 = vld [vmem:[#allocation4 + $0xb8] sm:$0xff]  ;;  %v797_v34 = vpack.c.bf16 %v276_v31, %v274_v30  ;;  %v278_v36 = vld [vmem:[#allocation4 + $0xa0] sm:$0xff]  ;;  %v280_v37 = vld [vmem:[#allocation4 + $0xb0] sm:$0xff]  ;;  %s1179_s6 = smov (!%p402_p8, %s746_s6), 0 }
  0x3e   : > { %v799_v35 = vpack.c.bf16 %v281_v33, %v279_v32  ;;  %v283_v38 = vld [vmem:[#allocation4 + $0xc8] sm:$0xff]  ;;  %v285_v39 = vld [vmem:[#allocation4 + $0xd8] sm:$0xff]  ;;  %v801_v40 = vpack.c.bf16 %v280_v37, %v278_v36  ;;  %v282_v42 = vld [vmem:[#allocation4 + $0xc0] sm:$0xff]  ;;  %895 = sdivrem.u32 %s1179_s6, 3  ;;  %v987_v36 = vmov 0.0  }
  0x3f   : > { %v803_v41 = vpack.c.bf16 %v285_v39, %v283_v38  ;;  %v284_v43 = vld [vmem:[#allocation4 + $0xd0] sm:$0xff]  ;;  %v287_v44 = vld [vmem:[#allocation4 + $0xe8] sm:$0xff]  ;;  %v289_v45 = vld [vmem:[#allocation4 + $0xf8] sm:$0xff]  ;;  %535 = vmatprep.mubr.f32.mxu1 %v987_v36  ;;  %s445_s14 = scalar_select %p443_p12, 1.0, 0.0 }
  0x40   : > { %v805_v46 = vpack.c.bf16 %v284_v43, %v282_v42  ;;  %v807_v47 = vpack.c.bf16 %v289_v45, %v287_v44  ;;  %v286_v48 = vld [vmem:[#allocation4 + $0xe0] sm:$0xff]  ;;  %v288_v49 = vld [vmem:[#allocation4 + $0xf0] sm:$0xff]  ;;  %v291_v50 = vld [vmem:[#allocation4 + $0x108] sm:$0xff]  ;;  %s444_s20 = scalar_select %p443_p12, 2.0, 1.0 }
  0x41   : > { %s892_s25 = spop.drf %891  ;;  %v293_v51 = vld [vmem:[#allocation4 + $0x118] sm:$0xff]  ;;  %v809_v52 = vpack.c.bf16 %v288_v49, %v286_v48  ;;  %v290_v54 = vld [vmem:[#allocation4 + $0x100] sm:$0xff]  ;;  %v292_v55 = vld [vmem:[#allocation4 + $0x110] sm:$0xff]  ;;  %v451_v37 = vstv %s445_s14 }
  0x42   : > { %786 = vmatpush1.bf16.xpose.msra.mxu0 %v785_v15  ;;  %s237_s26 = ssub.s32 0, %s892_s25  ;;  %v811_v53 = vpack.c.bf16 %v293_v51, %v291_v50  ;;  %v295_v56 = vld [vmem:[#allocation4 + $0x128] sm:$0xff]  ;;  %v297_v57 = vld [vmem:[#allocation4 + $0x138] sm:$0xff]  ;;  %v813_v58 = vpack.c.bf16 %v292_v55, %v290_v54  ;;  %v294_v60 = vld [vmem:[#allocation4 + $0x120] sm:$0xff]  ;;  %s894_s7 = spop.drf %893  ;;  %v988_v55 = vmov (!%p767_p13), 0.0  }
  0x43   : > { %788 = vmatprep.subr.bf16.mxu0 %v787_v16  ;;  %s1175_s26 = smov (!%p232_p3, %s237_s26), %s892_s25  ;;  %v815_v59 = vpack.c.bf16 %v297_v57, %v295_v56  ;;  %v296_v61 = vld [vmem:[#allocation4 + $0x130] sm:$0xff]  ;;  %v299_v62 = vld [vmem:[#allocation4 + $0x148] sm:$0xff]  ;;  %v301_v63 = vld [vmem:[#allocation4 + $0x158] sm:$0xff]  ;;  %s424_s9 = ssub.s32 0, %s894_s7  ;;  %v989_v57 = vmov (!%p767_p13), 0  }
  0x44   : > { %p742_p6 = scmp.lt.s32.totalorder %s1175_s26, 0  ;;  %s243_s27 = sadd.s32 3, %s1175_s26  ;;  %v817_v0 = vpack.c.bf16 %v296_v61, %v294_v60  ;;  %v819_v1 = vpack.c.bf16 %v301_v63, %v299_v62  ;;  %v298_v2 = vld [vmem:[#allocation4 + $0x140] sm:$0xff]  ;;  %v300_v3 = vld [vmem:[#allocation4 + $0x150] sm:$0xff]  ;;  %v303_v4 = vld [vmem:[#allocation4 + $0x168] sm:$0xff]  ;;  %897 = vset.pattern.permute.xlu0 (!%p767_p13), %v989_v57 }
  0x45   : > { %v305_v5 = vld [vmem:[#allocation4 + $0x178] sm:$0xff]  ;;  %v821_v6 = vpack.c.bf16 %v300_v3, %v298_v2  ;;  %v302_v8 = vld [vmem:[#allocation4 + $0x160] sm:$0xff]  ;;  %v304_v9 = vld [vmem:[#allocation4 + $0x170] sm:$0xff]  ;;  %s1181_s9 = smov (!%p419_p10, %s424_s9), %s894_s7 }
  0x46   : > { %s1177_s27 = smov (!%p742_p6, %s243_s27), %s1175_s26  ;;  %v823_v7 = vpack.c.bf16 %v305_v5, %v303_v4  ;;  %v307_v10 = vld [vmem:[#allocation4 + $0x188] sm:$0xff]  ;;  %v309_v11 = vld [vmem:[#allocation4 + $0x198] sm:$0xff]  ;;  %v825_v12 = vpack.c.bf16 %v304_v9, %v302_v8  ;;  %v306_v14 = vld [vmem:[#allocation4 + $0x180] sm:$0xff]  ;;  %p758_p11 = scmp.lt.s32.totalorder %s1181_s9, 0 }
  0x47   : > { %s743_s28 = sshll.u32 %s1177_s27, 3  ;;  %v827_v13 = vpack.c.bf16 %v309_v11, %v307_v10  ;;  %v308_v15 = vld [vmem:[#allocation4 + $0x190] sm:$0xff]  ;;  %v311_v16 = vld [vmem:[#allocation4 + $0x1a8] sm:$0xff]  ;;  %v313_v17 = vld [vmem:[#allocation4 + $0x1b8] sm:$0xff]  ;;  %s896_s8 = spop.drf %895 }
  0x48   : > { %s248_s29 = sshra.s32 %s743_s28, 3  ;;  %v829_v18 = vpack.c.bf16 %v308_v15, %v306_v14  ;;  %v831_v19 = vpack.c.bf16 %v313_v17, %v311_v16  ;;  %v310_v20 = vld [vmem:[#allocation4 + $0x1a0] sm:$0xff]  ;;  %v317_v23 = vld [vmem:[#allocation4 + $0x1d8] sm:$0xff]  ;;  %v320_v33 = vld [vmem:[#allocation4 + $0x1f0] sm:$0xff]  ;;  %s755_s10 = sshll.u32 %s896_s8, 3 }
  0x49   : > { %s776_s30 = sshll.u32 %s248_s29, 4  ;;  %v314_v26 = vld [vmem:[#allocation4 + $0x1c0] sm:$0xff]  ;;  %s435_s11 = sshra.s32 %s755_s10, 3  ;;  %v545_v54 = vld [vmem:[%s1158_s2] sm:$0xff] (!%p767_p13) }
  0x4a   : > { %790 = vmatpush1.bf16.xpose.msra.mxu0 %v789_v21  ;;  %s1092_s5 = scalar_lea.vmem [#allocation2], %s776_s30  ;;  %v312_v21 = vld [vmem:[#allocation4 + $0x1b0] sm:$0xff]  ;;  %v318_v32 = vld [vmem:[#allocation4 + $0x1e0] sm:$0xff]  ;;  %s430_s12 = sadd.s32 3, %s1181_s9 }
  0x4b   : > { %792 = vmatprep.subr.bf16.mxu0 %v791_v22  ;;  %v255_v27 = vld [vmem:[%s1092_s5 + $0x8] sm:$0xff]  ;;  %v315_v22 = vld [vmem:[#allocation4 + $0x1c8] sm:$0xff]  ;;  %v833_v24 = vpack.c.bf16 %v312_v21, %v310_v20  ;;  %s777_s13 = sshll.u32 %s435_s11, 4  ;;  %s1183_s12 = smov (!%p758_p11, %s430_s12), %s1181_s9  ;;  %v546_v56 = vld [vmem:[%s1159_s3] sm:$0xff] (!%p767_p13) }
  0x4c   : > { %386 = vmatprep.mubr.f32.mxu0 %v255_v27  ;;  %v835_v25 = vpack.c.bf16 %v317_v23, %v315_v22  ;;  %v316_v27 = vld [vmem:[#allocation4 + $0x1d0] sm:$0xff]  ;;  %s759_s21 = sshll.u32 %s1183_s12, 3  ;;  %s440_s23 = scalar_lea.vmem [#allocation2], %s777_s13  ;;  %627 = vperm.xlu0 (!%p767_p13), %897, %v546_v56  }
  0x4d   : > { %v837_v30 = vpack.c.bf16 %v316_v27, %v314_v26  ;;  %v441_v38 = vld [vmem:[%s440_s23] sm:$0xff]  ;;  %v442_v39 = vld [vmem:[%s440_s23 + $0x8] sm:$0xff]  ;;  %s456_s24 = sshra.s32 %s759_s21, 3  ;;  %s693_s28 = scalar_lea.vmem %s1158_s2, %s764_s22 }
  0x4e   : > { %v453_v43 = vmul.f32 %v451_v37, %v442_v39  ;;  %s778_s25 = sshll.u32 %s456_s24, 4  ;;  %v765_v49 = vld [vmem:[%s693_s28 + $0x8] sm:$0xff] }
  0x4f   : > { %s461_s29 = scalar_lea.vmem [#allocation2], %s778_s25 }
  0x52   : > { %794 = vmatpush1.bf16.xpose.msra.mxu0 %v793_v28  ;;  %v319_v28 = vld [vmem:[#allocation4 + $0x1e8] sm:$0xff] }
  0x53   : > { %796 = vmatprep.subr.bf16.mxu0 %v795_v29  ;;  %v321_v29 = vld [vmem:[#allocation4 + $0x1f8] sm:$0xff] }
  0x54   : > { %v839_v31 = vpack.c.bf16 %v321_v29, %v319_v28 }
  0x5a   : > { %798 = vmatpush1.bf16.xpose.msra.mxu0 %v797_v34  ;;  %v841_v34 = vpack.c.bf16 %v320_v33, %v318_v32 }
  0x5b   : > { %800 = vmatprep.subr.bf16.mxu0 %v799_v35  ;;  %v254_v35 = vld [vmem:[%s1092_s5] sm:$0xff] }
  0x62   : > { %802 = vmatpush1.bf16.xpose.msra.mxu0 %v801_v40  ;;  %v448_v40 = vstv %s444_s20 }
  0x63   : > { %804 = vmatprep.subr.bf16.mxu0 %v803_v41  ;;  %v452_v41 = vmul.f32 %v451_v37, %v441_v38 }
  0x6a   : > { %806 = vmatpush1.bf16.xpose.msra.mxu0 %v805_v46 }
  0x6b   : > { %808 = vmatprep.subr.bf16.mxu0 %v807_v47 }
  0x72   : > { %810 = vmatpush1.bf16.xpose.msra.mxu0 %v809_v52  ;;  %v550_v52 = vld [vmem:[%s1157_s1 + $0x8] sm:$0xff] (!%p767_p13) }
  0x73   : > { %812 = vmatprep.subr.bf16.mxu0 %v811_v53  ;;  %v549_v53 = vld [vmem:[%s1157_s1] sm:$0xff] (!%p767_p13) }
  0x7a   : > { %814 = vmatpush1.bf16.xpose.msra.mxu0 %v813_v58 }
  0x7b   : > { %816 = vmatprep.subr.bf16.mxu0 %v815_v59 }
  0x82   : > { %818 = vmatpush1.bf16.xpose.msra.mxu0 %v817_v0 }
  0x83   : > { %820 = vmatprep.subr.bf16.mxu0 %v819_v1 }
  0x8a   : > { %822 = vmatpush1.bf16.xpose.msra.mxu0 %v821_v6 }
  0x8b   : > { %824 = vmatprep.subr.bf16.mxu0 %v823_v7 }
  0x92   : > { %826 = vmatpush1.bf16.xpose.msra.mxu0 %v825_v12 }
  0x93   : > { %828 = vmatprep.subr.bf16.mxu0 %v827_v13 }
  0x9a   : > { %830 = vmatpush1.bf16.xpose.msra.mxu0 %v829_v18 }
  0x9b   : > { %832 = vmatprep.subr.bf16.mxu0 %v831_v19 }
  0xa2   : > { %834 = vmatpush1.bf16.xpose.msra.mxu0 %v833_v24 }
  0xa3   : > { %836 = vmatprep.subr.bf16.mxu0 %v835_v25 }
  0xaa   : > { %838 = vmatpush1.bf16.xpose.msra.mxu0 %v837_v30 }
  0xab   : > { %840 = vmatprep.subr.bf16.mxu0 %v839_v31 }
  0xb2   : > { %842 = vmatpush1.bf16.xpose.msra.mxu0 %v841_v34 }
  0xb3   : > { %554 = vmatprep.subr.mxu0 (!%p767_p13), %v550_v52 }
  0xb9   : > { %387 = vmatmul.mubr.f32.vlgmr.msra.gmra.mrb[0].mxu0 %v254_v35 }
  0xba   : > { %618 = vmatprep.mubr.f32.mxu0 (!%p767_p13), %v988_v55  ;;  %555 = vmatpush1.msra.mxu0 (!%p767_p13), %v549_v53 }
  0xcb   : > { %v628_v58 = vpop.permute.xlu0 (!%p767_p13), %627 }
 0x18c   : > { %v388_v42 = vpop.f32.mrb[0].mxu0 }
 0x18d   : > { %v449_v44 = vmul.f32 %v448_v40, %v388_v42  ;;  %v390_v45 = vpop.f32.mrb[1].mxu0  ;;  %768 = vmatmul.mubr.msk.f32.vlgmr.msra.gmra.mrb[0].mxu0 (!%p767_p13), %vm467_vm0, %v545_v54 }
 0x18e   : > { %v450_v46 = vmul.f32 %v448_v40, %v390_v45 }
 0x18f   : > { %v454_v47 = vsub.f32 %v449_v44, %v452_v41 }
 0x190   : > { %v455_v48 = vsub.f32 %v450_v46, %v453_v43 }
 0x191   : > { %462 = vst [vmem:[%s461_s29] sm:$0xff] %v454_v47 }
 0x192   : > { %471 = vmatprep.subr.mxu1 %v455_v48  ;;  %463 = vst [vmem:[%s461_s29 + $0x8] sm:$0xff] %v455_v48 }
 0x193   : > { %472 = vmatpush1.msra.mxu1 %v454_v47 }
 0x194   : > { %766 = vmatmul.mubr.msk.f32.vlgmr.msra.gmra.mrb[0].mxu1 %vm467_vm0, %v765_v49 }
 0x260   : > { %v620_v59 = vpop.f32.mrb[0].mxu0 (!%p767_p13) }
 0x261   : > { %v630_v60 = vadd.f32 (!%p767_p13), %v628_v58, %v620_v59  ;;  %v622_v61 = vpop.f32.mrb[1].mxu0 (!%p767_p13) }
 0x262   : > { %544 = sbr.rel (%p767_p13) target bundleno = 620 (0x26c), region = 56  ;;  %v631_v62 = vadd.f32 (!%p767_p13), %v628_v58, %v622_v61 }
 0x267   : > { %v537_v50 = vpop.f32.mrb[0].mxu1 }
 0x268   : > { %v539_v51 = vpop.f32.mrb[1].mxu1  ;;  %v632_v63 = vadd.f32 (!%p767_p13), %v630_v60, %v537_v50 }
 0x269   : > { %v633_v0 = vadd.f32 %v631_v62, %v539_v51 }
 0x26a   : > { %636 = vst [vmem:[#allocation7] sm:$0xff] %v632_v63 }
 0x26b   : > { %637 = vst [vmem:[#allocation7 + $0x8] sm:$0xff] %v633_v0 }
 0x26c PF: > { %p769_p0 = scmp.le.s32.totalorder %s974_s15, 0 }
 0x26e   : > { %640 = sbr.rel (%p769_p0) target bundleno = 630 (0x276), region = 60 }
 0x271   : > { %v643_v1 = vld [vmem:[#allocation7] sm:$0xff] (!%p769_p0) }
 0x272   : > { %v644_v2 = vld [vmem:[#allocation7 + $0x8] sm:$0xff] (!%p769_p0)  ;;  %v645_v3 = vadd.f32 (!%p769_p0), %v643_v1, %v537_v50 }
 0x273   : > { %v646_v4 = vadd.f32 (!%p769_p0), %v644_v2, %v539_v51 }
 0x274   : > { %647 = vst [vmem:[#allocation7] sm:$0xff] (!%p769_p0), %v645_v3 }
 0x275   : > { %648 = vst [vmem:[#allocation7 + $0x8] sm:$0xff] %v646_v4 }
 0x276 PF: > { %p1121_p1 = scmp.eq.s32.totalorder %s733_s18, 1  ;;  %s990_s13 = smov [#allocation7]  }
 0x277   : > { %s656_s14 = sshll.u32 %s990_s13, 4  ;;  %s657_s14 = int_to_ptr.vmem [resolvable:$true] %s656_s14 }
 0x278   : > { %s926_s20 = scalar_lea.vmem %s657_s14, 256  ;;  %p933_p9 = scmp.lt.s32.totalorder %s657_s14, %s657_s14 }
 0x279   : > { %p927_p2 = scmp.ne.s32.totalorder %s657_s14, %s926_s20  ;;  %p934_p4 = scmp.lt.s32.totalorder %s926_s20, %s926_s20 }
 0x27b   : > { %p928_p5 = pnand %p927_p2, %p1121_p1  ;;  %p935_p3 = por %p934_p4, %p933_p9 }
 0x27d   : > { %p929_p7 = pneg %p928_p5 }
 0x27f   : > { %p936_p6 = pnand %p935_p3, %p929_p7 }
 0x281   : > { %939 = shalt.err (!%p936_p6)
}
 0x282   : > { %s940_s18 = scalar_lea.hbm %s1160_s4, 256 }
 0x283   : > { %p941_p8 = scmp.ne.s32.totalorder %s1160_s4, %s940_s18  ;;  %p946_p12 = scmp.lt.u32.totalorder %s940_s18, %s1160_s4 }
 0x285   : > { %p942_p10 = pnand %p941_p8, %p1121_p1 }
 0x287   : > { %p943_p11 = pneg %p942_p10 }
 0x289   : > { %p948_p13 = pnand %p946_p12, %p943_p11 }
 0x28b   : > { %951 = shalt.err (!%p948_p13)
}
 0x28c   : > { %848 = dma.vmem_to_hbm [thread:$0]  (%p1121_p1), %s657_s14, 256, %s1160_s4, [#allocation6]  }
 0x28d   : > { %969 = dma.done.wait (%p1121_p1), [#allocation6], 256  }
 0x28e   : > { %971 = vsyncadd (%p1121_p1), [#allocation6], 4294967040 }
 0x28f PF: > { %s16_s17 = sadd.s32 1, %s982_s17   ;;  %s1170_s15 = smov %s978_s16 }
 0x290   : > { %p13_p0 = scmp.ge.s32.totalorder %s16_s17, 4   ;;  %s1171_s16 = smov %s1173_s19 }
 0x292   :  { %15 = sbr.rel (!%p13_p0) target bundleno = 3 (0x3), region = 93 }
 0x299   :  { %669 = vsyncpa [#allocation5], 1 }
 0x29a   :  { %671 = vsyncpa [#allocation5 + $0x1], 1 }
 0x29b   :  { %672 = vsyncpa [#allocation6], 1 }
 0x29c   :  { %674 = vsyncpa [#allocation6 + $0x1], 1 }

</bundles_post_ra>
